<compile_context>
chip_gen: v7x
topology: tpu7x:2x2x1
jax: 0.10.0
libtpu: 0.0.40
codegen_flags: <defaults>
</compile_context>

<pallas_src>
import functools

import jax
import jax.numpy as jnp
import numpy as np
from jax.experimental import pallas as pl
from jax.experimental.pallas import tpu as pltpu


def _round_up(x, m):
    return (x + m - 1) // m * m


def _deconv_stats_kernel(x_body_ref, x_top_ref, x_bot_ref, w_ref,
                         raw_ref, stats_ref, xpad_ref, *, fuse_taps):
    """Grid step = (image n, row tile t).  Deconv parity slabs + per-tile IN stats.

    x_body_ref : (1, TH, W, Cin)   bf16  input rows [t*TH, t*TH+TH)
    x_top_ref  : (1, 1, W, Cin)    bf16  input row  t*TH-1   (clamped; zeroed when t == 0)
    x_bot_ref  : (1, 1, W, Cin)    bf16  input row  t*TH+TH  (clamped; zeroed when t == T-1)
    w_ref      : (4, 4*Cin, Cout)  bf16  fused tap weights, VMEM-resident (single copy)
    raw_ref    : (1, 4, TH*W, Cout) bf16 raw deconv parity slabs of this tile
    stats_ref  : (1, 1, 2, Cout)   f32   per-tile [sum; sum of squares]
    xpad_ref   : (TH+2, Wp, Cin)   bf16  zero-padded staging scratch (Wp = roundup(W+2, 8))
    """
    t = pl.program_id(1)
    n_t = pl.num_programs(1)
    _, TH, W, Cin = x_body_ref.shape
    Cout = w_ref.shape[-1]
    Wp = xpad_ref.shape[1]
    THW = TH * W
    zrow = jnp.zeros((1, W, Cin), xpad_ref.dtype)

    # --- stage the zero-padded input tile in VMEM, all in bf16 (no f32 round trip). -----------
    # The whole scratch is rewritten every grid step, so megacore-parallel sharding stays safe.
    xpad_ref[:, pl.ds(0, 1), :] = jnp.zeros((TH + 2, 1, Cin), xpad_ref.dtype)
    xpad_ref[:, pl.ds(W + 1, Wp - W - 1), :] = jnp.zeros((TH + 2, Wp - W - 1, Cin),
                                                         xpad_ref.dtype)
    xpad_ref[pl.ds(0, 1), pl.ds(1, W), :] = x_top_ref[0]
    xpad_ref[pl.ds(1, TH), pl.ds(1, W), :] = x_body_ref[0]
    xpad_ref[pl.ds(TH + 1, 1), pl.ds(1, W), :] = x_bot_ref[0]

    @pl.when(t == 0)
    def _():  # top halo row lies outside the image
        xpad_ref[pl.ds(0, 1), pl.ds(1, W), :] = zrow

    @pl.when(t == n_t - 1)
    def _():  # bottom halo row lies outside the image
        xpad_ref[pl.ds(TH + 1, 1), pl.ds(1, W), :] = zrow

    if fuse_taps:
        # Small-Cin path: fuse the 4 (d,e) taps into one K=4*Cin matmul per parity so the MXU
        # contraction depth is not underfilled.
        # x4[i, j, (2d+e)*Cin + c] = xpad[i+d, j+e, c]
        x4 = jnp.concatenate(
            [xpad_ref[pl.ds(d, TH + 1), pl.ds(e, W + 1), :]
             for d in range(2) for e in range(2)],
            axis=-1)                                       # (TH+1, W+1, 4*Cin) bf16

    # out[2I+r, 2J+s, co] = sum_{d,e,ci} xpad[i+r+d, j+s+e, ci] * weight[ci, co, 3-r-2d, 3-s-2e]
    ssum = jnp.zeros((1, Cout), jnp.float32)
    ssq = jnp.zeros((1, Cout), jnp.float32)
    for r in range(2):
        for s in range(2):
            p = 2 * r + s
            if fuse_taps:
                patch = x4[r:r + TH, s:s + W, :].reshape(THW, 4 * Cin)    # bf16
                acc = jnp.dot(patch, w_ref[p], preferred_element_type=jnp.float32)
            else:
                # Large-Cin path: K=Cin already saturates the MXU (128 on v5e, 256 on v6e/v7x),
                # so skip the x4/patch materialization and accumulate 4 K=Cin dots directly
                # from shifted xpad slices into the f32 accumulator.
                acc = jnp.zeros((THW, Cout), jnp.float32)
                for d in range(2):
                    for e in range(2):
                        q = 2 * d + e
                        lhs = xpad_ref[pl.ds(r + d, TH), pl.ds(s + e, W), :].reshape(THW, Cin)
                        acc = acc + jnp.dot(lhs, w_ref[p, q * Cin:(q + 1) * Cin, :],
                                            preferred_element_type=jnp.float32)
            # InstanceNorm partial stats from the f32 accumulator (before bf16 rounding).
            ssum = ssum + jnp.sum(acc, axis=0, keepdims=True)
            ssq = ssq + jnp.sum(acc * acc, axis=0, keepdims=True)
            raw_ref[0, p] = acc.astype(raw_ref.dtype)       # raw deconv slab, bf16 writeback

    stats_ref[0, 0] = jnp.concatenate([ssum, ssq], axis=0)  # (2, Cout) f32


def _norm_lrelu_kernel(raw_ref, stats_ref, out_ref, *, inv_n):
    """Normalize + LeakyReLU(0.1) one tile of the parity slabs.

    raw_ref   : (1, 4, THW, Cout) bf16   raw deconv slabs
    stats_ref : (1, 2, Cout)      f32    per-image [sum; sumsq] over all 2H*2W pixels
    out_ref   : (1, 4, THW, Cout) bf16   normalized + activated slabs
    """
    Cout = out_ref.shape[-1]
    st = stats_ref[0]                                        # (2, Cout) f32
    mean = st[0:1, :] * inv_n                                # (1, Cout)
    # One-pass variance in f32, clamped at 0 before eps.
    # TODO(synk): use two-pass / Welford stats for production if |mean| >> std.
    var = jnp.maximum(st[1:2, :] * inv_n - mean * mean, 0.0)
    inv_std = jax.lax.rsqrt(var + 1e-5)                      # EUP rsqrt, f32
    y = (raw_ref[0].astype(jnp.float32) - mean.reshape(1, 1, Cout)) * inv_std.reshape(1, 1, Cout)
    out_ref[0] = jnp.where(y >= 0, y, 0.1 * y).astype(out_ref.dtype)


def deconv4x4_forward(x, skip, weight, *, row_tile=None, fuse_taps=None,
                      vmem_cap_bytes=60 << 20):
    """x: (N, Cin, H, W), skip: (N, Cskip, 2H, 2W), weight: (Cin, Cout, 4, 4) (PyTorch layouts)."""
    N, Cin, H, W = x.shape
    Ns, Cskip, H2, W2 = skip.shape
    Cin_w, Cout, K1, K2 = weight.shape
    assert (Ns, H2, W2) == (N, 2 * H, 2 * W) and Cin_w == Cin and K1 == K2 == 4

    if fuse_taps is None:
        fuse_taps = Cin < 64          # beyond this K=Cin already saturates the MXU contraction
    if row_tile is None:
        # Largest divisor of H whose bf16 raw-output tile stays within ~1 MiB.
        budget = 1 << 20
        row_tile = 1
        for th in range(1, H + 1):
            if H % th == 0 and 4 * th * W * Cout * 2 <= budget:
                row_tile = th
    TH = row_tile
    assert H % TH == 0, "row_tile must divide H"
    T = H // TH
    THW = TH * W
    assert THW % 8 == 0, "row_tile * W must be a multiple of 8 (sublane tiling)"
    Wp = _round_up(W + 2, 8)          # sublane-aligned scratch width

    # NHWC bf16 input: half the input DMA bytes, full-rate MXU operand.
    x_nhwc = jnp.transpose(x, (0, 2, 3, 1)).astype(jnp.bfloat16)

    # Fused tap weights: w4[2r+s, (2d+e)*Cin + ci, co] = weight[ci, co, 3-r-2d, 3-s-2e]
    # (the non-fused path slices rows [q*Cin, (q+1)*Cin) of the same layout per tap q=2d+e).
    taps = []
    for r in range(2):
        for s in range(2):
            taps.append(jnp.concatenate(
                [weight[:, :, 3 - r - 2 * d, 3 - s - 2 * e] for d in range(2) for e in range(2)],
                axis=0))                                     # (4*Cin, Cout)
    w4 = jnp.stack(taps, axis=0).astype(jnp.bfloat16)        # (4, 4*Cin, Cout)

    # Explicit scoped-VMEM limit sized from the resident buffers, with headroom (review item).
    bf, f32 = 2, 4
    resident = (2 * (TH * W * Cin * bf + 2 * W * Cin * bf)   # double-buffered input blocks
                + (TH + 2) * Wp * Cin * bf                   # xpad scratch
                + 16 * Cin * Cout * bf                       # weight (single VMEM copy)
                + 2 * 4 * THW * Cout * bf                    # double-buffered raw-out block
                + 2 * 2 * Cout * f32                         # per-tile stats block
                + THW * Cout * f32                           # f32 accumulator value
                + (((TH + 1) * (W + 1) + THW) * 4 * Cin * bf if fuse_taps else THW * Cin * bf))
    vmem_limit = int(min(max(3 * resident + (8 << 20), 32 << 20), vmem_cap_bytes))

    deconv_kernel = functools.partial(_deconv_stats_kernel, fuse_taps=fuse_taps)
    raw, part_stats = pl.pallas_call(
        deconv_kernel,
        out_shape=(jax.ShapeDtypeStruct((N, 4, H * W, Cout), jnp.bfloat16),
                   jax.ShapeDtypeStruct((N, T, 2, Cout), jnp.float32)),
        grid_spec=pltpu.PrefetchScalarGridSpec(
            num_scalar_prefetch=0,
            grid=(N, T),
            in_specs=[
                # body rows of the tile
                pl.BlockSpec((1, TH, W, Cin), lambda n, t: (n, t, 0, 0)),
                # 1-row top / bottom halos (clamped at the image border; zeroed in-kernel there)
                pl.BlockSpec((1, 1, W, Cin),
                             lambda n, t: (n, jnp.maximum(t * TH - 1, 0), 0, 0)),
                pl.BlockSpec((1, 1, W, Cin),
                             lambda n, t: (n, jnp.minimum(t * TH + TH, H - 1), 0, 0)),
                # weight: single VMEM-resident copy, no per-step double buffer
                pl.BlockSpec(memory_space=pltpu.MemorySpace.VMEM),
            ],
            out_specs=[
                pl.BlockSpec((1, 4, THW, Cout), lambda n, t: (n, 0, t, 0)),
                pl.BlockSpec((1, 1, 2, Cout), lambda n, t: (n, t, 0, 0)),
            ],
            scratch_shapes=[pltpu.VMEM((TH + 2, Wp, Cin), jnp.bfloat16)],
        ),
        compiler_params=pltpu.CompilerParams(
            dimension_semantics=("parallel", "parallel"),    # no in-kernel reduction axis
            vmem_limit_bytes=vmem_limit),
    )(x_nhwc, x_nhwc, x_nhwc, w4)

    # Microscopic XLA reduce over row tiles -> per-image InstanceNorm stats (N, 2, Cout).
    stats = jnp.sum(part_stats, axis=1)

    norm_kernel = functools.partial(_norm_lrelu_kernel, inv_n=1.0 / (4.0 * H * W))
    y_par = pl.pallas_call(
        norm_kernel,
        out_shape=jax.ShapeDtypeStruct((N, 4, H * W, Cout), jnp.bfloat16),
        grid_spec=pltpu.PrefetchScalarGridSpec(
            num_scalar_prefetch=0,
            grid=(N, T),
            in_specs=[
                pl.BlockSpec((1, 4, THW, Cout), lambda n, t: (n, 0, t, 0)),
                pl.BlockSpec((1, 2, Cout), lambda n, t: (n, 0, 0)),
            ],
            out_specs=pl.BlockSpec((1, 4, THW, Cout), lambda n, t: (n, 0, t, 0)),
        ),
        compiler_params=pltpu.CompilerParams(
            dimension_semantics=("parallel", "parallel"),
            vmem_limit_bytes=int(min(max(8 * 4 * THW * Cout * bf + (8 << 20), 32 << 20),
                                     vmem_cap_bytes))),
    )(raw, stats)

    # Layout glue (pure XLA, no compute): de-interleave parity slabs straight into NCHW, then
    # concat with the never-transposed skip.
    y = y_par.reshape(N, 2, 2, H, W, Cout)        # (n, r, s, i, j, c)
    y = jnp.transpose(y, (0, 5, 3, 1, 4, 2))      # (n, c, i, r, j, s)
    y = y.reshape(N, Cout, 2 * H, 2 * W)
    return jnp.concatenate([y.astype(jnp.float32), skip.astype(jnp.float32)], axis=1)


def reference_forward(x, skip, weight):
    """Pure-JAX/XLA reference of the PyTorch module (NCHW, f32)."""
    w_conv = jnp.transpose(weight[:, :, ::-1, ::-1], (1, 0, 2, 3))   # (Cout, Cin, 4, 4)
    y = jax.lax.conv_general_dilated(
        x.astype(jnp.float32), w_conv.astype(jnp.float32),
        window_strides=(1, 1), padding=((2, 2), (2, 2)),
        lhs_dilation=(2, 2), rhs_dilation=(1, 1),
        dimension_numbers=("NCHW", "OIHW", "NCHW"),
        precision=jax.lax.Precision.HIGHEST,
    )
    mean = jnp.mean(y, axis=(2, 3), keepdims=True)
    var = jnp.mean(jnp.square(y - mean), axis=(2, 3), keepdims=True)
    y = (y - mean) / jnp.sqrt(var + 1e-5)
    y = jnp.where(y >= 0, y, 0.1 * y)
    return jnp.concatenate([y, skip.astype(jnp.float32)], axis=1)


if __name__ == "__main__":
    N, Cin, Cout, Cskip, H, W = 2, 8, 16, 8, 8, 8

    key = jax.random.PRNGKey(0)
    kx, ks, kw = jax.random.split(key, 3)
    x = jax.random.normal(kx, (N, Cin, H, W), dtype=jnp.float32)
    skip = jax.random.normal(ks, (N, Cskip, 2 * H, 2 * W), dtype=jnp.float32)
    # ConvTranspose2d weight shape: (in_c, out_c, kH, kW), deterministic synthetic init.
    weight = 0.05 * jax.random.normal(kw, (Cin, Cout, 4, 4), dtype=jnp.float32)

    # Reference on bf16-rounded x / weight: the kernel feeds the MXU in bf16 with f32
    # accumulation, so rounding the reference inputs identically isolates kernel-logic errors
    # from the expected bf16 input quantization.  The kernel's raw + final outputs are bf16,
    # hence the looser 3e-2 tolerance (post-norm values are O(1)).
    x_r = x.astype(jnp.bfloat16).astype(jnp.float32)
    w_r = weight.astype(jnp.bfloat16).astype(jnp.float32)
    ref = jax.block_until_ready(reference_forward(x_r, skip, w_r))

    # Exercise: multi-tile grid with halos + fused-K path, multi-tile non-fused (large-Cin)
    # path, and the auto-tuned defaults (single tile, fused).
    for row_tile, fuse in ((4, True), (2, False), (None, None)):
        out = jax.block_until_ready(
            deconv4x4_forward(x, skip, weight, row_tile=row_tile, fuse_taps=fuse))
        assert out.shape == (N, Cout + Cskip, 2 * H, 2 * W)
        np.testing.assert_allclose(np.asarray(out), np.asarray(ref), rtol=3e-2, atol=3e-2)

    print("KERNEL_OK")
</pallas_src>

<mosaic_0001>
module attributes {stable_mosaic.version = 11 : i64} {
  func.func @_deconv_stats_kernel(%arg0: i32, %arg1: i32, %arg2: memref<1x4x8x8xbf16, #tpu.memory_space<vmem>>, %arg3: memref<1x1x8x8xbf16, #tpu.memory_space<vmem>>, %arg4: memref<1x1x8x8xbf16, #tpu.memory_space<vmem>>, %arg5: memref<4x32x16xbf16, #tpu.memory_space<vmem>>, %arg6: memref<1x4x32x16xbf16, #tpu.memory_space<vmem>>, %arg7: memref<1x1x2x16xf32, #tpu.memory_space<vmem>>, %arg8: memref<6x16x8xbf16, #tpu.memory_space<vmem>>) attributes {dimension_semantics = [#tpu.dimension_semantics<parallel>, #tpu.dimension_semantics<parallel>], iteration_bounds = array<i64: 2, 2>, scalar_prefetch = 0 : i64, scratch_operands = 1 : i64, tpu.core_type = #tpu.core_type<tc>, window_params = [{transform_indices = @transform_0, window_bounds = array<i64: 1, 4, 8, 8>}, {transform_indices = @transform_1, window_bounds = array<i64: 1, 1, 8, 8>}, {transform_indices = @transform_2, window_bounds = array<i64: 1, 1, 8, 8>}, {pipeline_mode = #tpu.pipeline_mode<synchronous>, transform_indices = @transform_3, window_bounds = array<i64: 4, 32, 16>}, {transform_indices = @transform_4, window_bounds = array<i64: 1, 4, 32, 16>}, {transform_indices = @transform_5, window_bounds = array<i64: 1, 1, 2, 16>}]} {
    %cst = arith.constant 0.000000e+00 : bf16
    %0 = vector.broadcast %cst : bf16 to vector<1x8x8xbf16>
    %cst_0 = arith.constant 0.000000e+00 : bf16
    %1 = vector.broadcast %cst_0 : bf16 to vector<6x1x8xbf16>
    %c0 = arith.constant 0 : index
    %c0_1 = arith.constant 0 : index
    %c0_2 = arith.constant 0 : index
    %2 = vector.load %arg8[%c0, %c0_1, %c0_2] : memref<6x16x8xbf16, #tpu.memory_space<vmem>>, vector<6x1x8xbf16>
    tpu.vector_store %arg8[%c0, %c0_1, %c0_2], %1 {strides = array<i32>} : memref<6x16x8xbf16, #tpu.memory_space<vmem>>, vector<6x1x8xbf16>,
    %cst_3 = arith.constant 0.000000e+00 : bf16
    %3 = vector.broadcast %cst_3 : bf16 to vector<6x7x8xbf16>
    %c0_4 = arith.constant 0 : index
    %c9 = arith.constant 9 : index
    %c0_5 = arith.constant 0 : index
    %4 = vector.load %arg8[%c0_4, %c9, %c0_5] : memref<6x16x8xbf16, #tpu.memory_space<vmem>>, vector<6x7x8xbf16>
    tpu.vector_store %arg8[%c0_4, %c9, %c0_5], %3 {strides = array<i32>} : memref<6x16x8xbf16, #tpu.memory_space<vmem>>, vector<6x7x8xbf16>,
    %c0_6 = arith.constant 0 : index
    %c0_7 = arith.constant 0 : index
    %c0_8 = arith.constant 0 : index
    %c0_9 = arith.constant 0 : index
    %5 = vector.load %arg3[%c0_6, %c0_7, %c0_8, %c0_9] : memref<1x1x8x8xbf16, #tpu.memory_space<vmem>>, vector<1x1x8x8xbf16>
    %6 = vector.shape_cast %5 : vector<1x1x8x8xbf16> to vector<1x8x8xbf16>
    %c0_10 = arith.constant 0 : index
    %c1 = arith.constant 1 : index
    %c0_11 = arith.constant 0 : index
    %7 = vector.load %arg8[%c0_10, %c1, %c0_11] : memref<6x16x8xbf16, #tpu.memory_space<vmem>>, vector<1x8x8xbf16>
    tpu.vector_store %arg8[%c0_10, %c1, %c0_11], %6 {strides = array<i32>} : memref<6x16x8xbf16, #tpu.memory_space<vmem>>, vector<1x8x8xbf16>,
    %c0_12 = arith.constant 0 : index
    %c0_13 = arith.constant 0 : index
    %c0_14 = arith.constant 0 : index
    %c0_15 = arith.constant 0 : index
    %8 = vector.load %arg2[%c0_12, %c0_13, %c0_14, %c0_15] : memref<1x4x8x8xbf16, #tpu.memory_space<vmem>>, vector<1x4x8x8xbf16>
    %9 = vector.shape_cast %8 : vector<1x4x8x8xbf16> to vector<4x8x8xbf16>
    %c1_16 = arith.constant 1 : index
    %c1_17 = arith.constant 1 : index
    %c0_18 = arith.constant 0 : index
    %10 = vector.load %arg8[%c1_16, %c1_17, %c0_18] : memref<6x16x8xbf16, #tpu.memory_space<vmem>>, vector<4x8x8xbf16>
    tpu.vector_store %arg8[%c1_16, %c1_17, %c0_18], %9 {strides = array<i32>} : memref<6x16x8xbf16, #tpu.memory_space<vmem>>, vector<4x8x8xbf16>,
    %c0_19 = arith.constant 0 : index
    %c0_20 = arith.constant 0 : index
    %c0_21 = arith.constant 0 : index
    %c0_22 = arith.constant 0 : index
    %11 = vector.load %arg4[%c0_19, %c0_20, %c0_21, %c0_22] : memref<1x1x8x8xbf16, #tpu.memory_space<vmem>>, vector<1x1x8x8xbf16>
    %12 = vector.shape_cast %11 : vector<1x1x8x8xbf16> to vector<1x8x8xbf16>
    %c5 = arith.constant 5 : index
    %c1_23 = arith.constant 1 : index
    %c0_24 = arith.constant 0 : index
    %13 = vector.load %arg8[%c5, %c1_23, %c0_24] : memref<6x16x8xbf16, #tpu.memory_space<vmem>>, vector<1x8x8xbf16>
    tpu.vector_store %arg8[%c5, %c1_23, %c0_24], %12 {strides = array<i32>} : memref<6x16x8xbf16, #tpu.memory_space<vmem>>, vector<1x8x8xbf16>,
    %c0_i32 = arith.constant 0 : i32
    %14 = arith.cmpi eq, %arg1, %c0_i32 : i32
    %15 = arith.extui %14 : i1 to i32
    %c0_i32_25 = arith.constant 0 : i32
    %16 = arith.cmpi ne, %15, %c0_i32_25 : i32
    scf.if %16 {
      %c0_83 = arith.constant 0 : index
      %c1_84 = arith.constant 1 : index
      %c0_85 = arith.constant 0 : index
      %95 = vector.load %arg8[%c0_83, %c1_84, %c0_85] : memref<6x16x8xbf16, #tpu.memory_space<vmem>>, vector<1x8x8xbf16>
      tpu.vector_store %arg8[%c0_83, %c1_84, %c0_85], %0 {strides = array<i32>} : memref<6x16x8xbf16, #tpu.memory_space<vmem>>, vector<1x8x8xbf16>,
    } else {
    }
    %c1_i32 = arith.constant 1 : i32
    %17 = arith.cmpi eq, %arg1, %c1_i32 : i32
    %18 = arith.extui %17 : i1 to i32
    %c0_i32_26 = arith.constant 0 : i32
    %19 = arith.cmpi ne, %18, %c0_i32_26 : i32
    scf.if %19 {
      %c5_83 = arith.constant 5 : index
      %c1_84 = arith.constant 1 : index
      %c0_85 = arith.constant 0 : index
      %95 = vector.load %arg8[%c5_83, %c1_84, %c0_85] : memref<6x16x8xbf16, #tpu.memory_space<vmem>>, vector<1x8x8xbf16>
      tpu.vector_store %arg8[%c5_83, %c1_84, %c0_85], %0 {strides = array<i32>} : memref<6x16x8xbf16, #tpu.memory_space<vmem>>, vector<1x8x8xbf16>,
    } else {
    }
    %c0_27 = arith.constant 0 : index
    %c0_28 = arith.constant 0 : index
    %c0_29 = arith.constant 0 : index
    %20 = vector.load %arg8[%c0_27, %c0_28, %c0_29] : memref<6x16x8xbf16, #tpu.memory_space<vmem>>, vector<5x9x8xbf16>
    %c0_30 = arith.constant 0 : index
    %c1_31 = arith.constant 1 : index
    %c0_32 = arith.constant 0 : index
    %21 = vector.load %arg8[%c0_30, %c1_31, %c0_32] : memref<6x16x8xbf16, #tpu.memory_space<vmem>>, vector<5x9x8xbf16>
    %c1_33 = arith.constant 1 : index
    %c0_34 = arith.constant 0 : index
    %c0_35 = arith.constant 0 : index
    %22 = vector.load %arg8[%c1_33, %c0_34, %c0_35] : memref<6x16x8xbf16, #tpu.memory_space<vmem>>, vector<5x9x8xbf16>
    %c1_36 = arith.constant 1 : index
    %c1_37 = arith.constant 1 : index
    %c0_38 = arith.constant 0 : index
    %23 = vector.load %arg8[%c1_36, %c1_37, %c0_38] : memref<6x16x8xbf16, #tpu.memory_space<vmem>>, vector<5x9x8xbf16>
    %24 = tpu.concatenate %20, %21, %22, %23 in 2 : vector<5x9x8xbf16>, vector<5x9x8xbf16>, vector<5x9x8xbf16>, vector<5x9x8xbf16> -> vector<5x9x32xbf16>
    %cst_39 = arith.constant 0.000000e+00 : f32
    %25 = vector.broadcast %cst_39 : f32 to vector<1x16xf32>
    %cst_40 = arith.constant 0.000000e+00 : f32
    %26 = vector.broadcast %cst_40 : f32 to vector<1x16xf32>
    %27 = vector.extract_strided_slice %24 {offsets = [0, 0, 0], sizes = [4, 8, 32], strides = [1, 1, 1]} : vector<5x9x32xbf16> to vector<4x8x32xbf16>
    %28 = vector.shape_cast %27 : vector<4x8x32xbf16> to vector<32x32xbf16>
    %c0_41 = arith.constant 0 : index
    %c0_42 = arith.constant 0 : index
    %c0_43 = arith.constant 0 : index
    %29 = vector.load %arg5[%c0_41, %c0_42, %c0_43] : memref<4x32x16xbf16, #tpu.memory_space<vmem>>, vector<1x32x16xbf16>
    %30 = vector.shape_cast %29 : vector<1x32x16xbf16> to vector<32x16xbf16>
    %cst_44 = arith.constant dense<0.000000e+00> : vector<32x16xf32>
    %31 = tpu.matmul %28, %30, %cst_44 {dimension_numbers = #tpu.dot_dimension_numbers<[1], [0], [0], [1], [0, 0, 1, 1], [], []>} : vector<32x32xbf16>, vector<32x16xbf16>, vector<32x16xf32> -> vector<32x16xf32>
    %cst_45 = arith.constant dense<0.000000e+00> : vector<16xf32>
    %32 = vector.multi_reduction <add>, %31, %cst_45 [0] : vector<32x16xf32> to vector<16xf32>
    %33 = vector.shape_cast %32 : vector<16xf32> to vector<1x16xf32>
    %34 = arith.addf %25, %33 : vector<1x16xf32>
    %35 = arith.mulf %31, %31 : vector<32x16xf32>
    %cst_46 = arith.constant dense<0.000000e+00> : vector<16xf32>
    %36 = vector.multi_reduction <add>, %35, %cst_46 [0] : vector<32x16xf32> to vector<16xf32>
    %37 = vector.shape_cast %36 : vector<16xf32> to vector<1x16xf32>
    %38 = arith.addf %26, %37 : vector<1x16xf32>
    %39 = arith.truncf %31 : vector<32x16xf32> to vector<32x16xbf16>
    %c0_47 = arith.constant 0 : index
    %c0_48 = arith.constant 0 : index
    %c0_49 = arith.constant 0 : index
    %c0_50 = arith.constant 0 : index
    %40 = vector.load %arg6[%c0_47, %c0_48, %c0_49, %c0_50] : memref<1x4x32x16xbf16, #tpu.memory_space<vmem>>, vector<1x1x32x16xbf16>
    %41 = vector.shape_cast %40 : vector<1x1x32x16xbf16> to vector<32x16xbf16>
    %42 = vector.shape_cast %39 : vector<32x16xbf16> to vector<1x1x32x16xbf16>
    tpu.vector_store %arg6[%c0_47, %c0_48, %c0_49, %c0_50], %42 {strides = array<i32>} : memref<1x4x32x16xbf16, #tpu.memory_space<vmem>>, vector<1x1x32x16xbf16>,
    %43 = vector.extract_strided_slice %24 {offsets = [0, 1, 0], sizes = [4, 8, 32], strides = [1, 1, 1]} : vector<5x9x32xbf16> to vector<4x8x32xbf16>
    %44 = vector.shape_cast %43 : vector<4x8x32xbf16> to vector<32x32xbf16>
    %c1_51 = arith.constant 1 : index
    %c0_52 = arith.constant 0 : index
    %c0_53 = arith.constant 0 : index
    %45 = vector.load %arg5[%c1_51, %c0_52, %c0_53] : memref<4x32x16xbf16, #tpu.memory_space<vmem>>, vector<1x32x16xbf16>
    %46 = vector.shape_cast %45 : vector<1x32x16xbf16> to vector<32x16xbf16>
    %cst_54 = arith.constant dense<0.000000e+00> : vector<32x16xf32>
    %47 = tpu.matmul %44, %46, %cst_54 {dimension_numbers = #tpu.dot_dimension_numbers<[1], [0], [0], [1], [0, 0, 1, 1], [], []>} : vector<32x32xbf16>, vector<32x16xbf16>, vector<32x16xf32> -> vector<32x16xf32>
    %cst_55 = arith.constant dense<0.000000e+00> : vector<16xf32>
    %48 = vector.multi_reduction <add>, %47, %cst_55 [0] : vector<32x16xf32> to vector<16xf32>
    %49 = vector.shape_cast %48 : vector<16xf32> to vector<1x16xf32>
    %50 = arith.addf %34, %49 : vector<1x16xf32>
    %51 = arith.mulf %47, %47 : vector<32x16xf32>
    %cst_56 = arith.constant dense<0.000000e+00> : vector<16xf32>
    %52 = vector.multi_reduction <add>, %51, %cst_56 [0] : vector<32x16xf32> to vector<16xf32>
    %53 = vector.shape_cast %52 : vector<16xf32> to vector<1x16xf32>
    %54 = arith.addf %38, %53 : vector<1x16xf32>
    %55 = arith.truncf %47 : vector<32x16xf32> to vector<32x16xbf16>
    %c0_57 = arith.constant 0 : index
    %c1_58 = arith.constant 1 : index
    %c0_59 = arith.constant 0 : index
    %c0_60 = arith.constant 0 : index
    %56 = vector.load %arg6[%c0_57, %c1_58, %c0_59, %c0_60] : memref<1x4x32x16xbf16, #tpu.memory_space<vmem>>, vector<1x1x32x16xbf16>
    %57 = vector.shape_cast %56 : vector<1x1x32x16xbf16> to vector<32x16xbf16>
    %58 = vector.shape_cast %55 : vector<32x16xbf16> to vector<1x1x32x16xbf16>
    tpu.vector_store %arg6[%c0_57, %c1_58, %c0_59, %c0_60], %58 {strides = array<i32>} : memref<1x4x32x16xbf16, #tpu.memory_space<vmem>>, vector<1x1x32x16xbf16>,
    %59 = vector.extract_strided_slice %24 {offsets = [1, 0, 0], sizes = [4, 8, 32], strides = [1, 1, 1]} : vector<5x9x32xbf16> to vector<4x8x32xbf16>
    %60 = vector.shape_cast %59 : vector<4x8x32xbf16> to vector<32x32xbf16>
    %c2 = arith.constant 2 : index
    %c0_61 = arith.constant 0 : index
    %c0_62 = arith.constant 0 : index
    %61 = vector.load %arg5[%c2, %c0_61, %c0_62] : memref<4x32x16xbf16, #tpu.memory_space<vmem>>, vector<1x32x16xbf16>
    %62 = vector.shape_cast %61 : vector<1x32x16xbf16> to vector<32x16xbf16>
    %cst_63 = arith.constant dense<0.000000e+00> : vector<32x16xf32>
    %63 = tpu.matmul %60, %62, %cst_63 {dimension_numbers = #tpu.dot_dimension_numbers<[1], [0], [0], [1], [0, 0, 1, 1], [], []>} : vector<32x32xbf16>, vector<32x16xbf16>, vector<32x16xf32> -> vector<32x16xf32>
    %cst_64 = arith.constant dense<0.000000e+00> : vector<16xf32>
    %64 = vector.multi_reduction <add>, %63, %cst_64 [0] : vector<32x16xf32> to vector<16xf32>
    %65 = vector.shape_cast %64 : vector<16xf32> to vector<1x16xf32>
    %66 = arith.addf %50, %65 : vector<1x16xf32>
    %67 = arith.mulf %63, %63 : vector<32x16xf32>
    %cst_65 = arith.constant dense<0.000000e+00> : vector<16xf32>
    %68 = vector.multi_reduction <add>, %67, %cst_65 [0] : vector<32x16xf32> to vector<16xf32>
    %69 = vector.shape_cast %68 : vector<16xf32> to vector<1x16xf32>
    %70 = arith.addf %54, %69 : vector<1x16xf32>
    %71 = arith.truncf %63 : vector<32x16xf32> to vector<32x16xbf16>
    %c0_66 = arith.constant 0 : index
    %c2_67 = arith.constant 2 : index
    %c0_68 = arith.constant 0 : index
    %c0_69 = arith.constant 0 : index
    %72 = vector.load %arg6[%c0_66, %c2_67, %c0_68, %c0_69] : memref<1x4x32x16xbf16, #tpu.memory_space<vmem>>, vector<1x1x32x16xbf16>
    %73 = vector.shape_cast %72 : vector<1x1x32x16xbf16> to vector<32x16xbf16>
    %74 = vector.shape_cast %71 : vector<32x16xbf16> to vector<1x1x32x16xbf16>
    tpu.vector_store %arg6[%c0_66, %c2_67, %c0_68, %c0_69], %74 {strides = array<i32>} : memref<1x4x32x16xbf16, #tpu.memory_space<vmem>>, vector<1x1x32x16xbf16>,
    %75 = vector.extract_strided_slice %24 {offsets = [1, 1, 0], sizes = [4, 8, 32], strides = [1, 1, 1]} : vector<5x9x32xbf16> to vector<4x8x32xbf16>
    %76 = vector.shape_cast %75 : vector<4x8x32xbf16> to vector<32x32xbf16>
    %c3 = arith.constant 3 : index
    %c0_70 = arith.constant 0 : index
    %c0_71 = arith.constant 0 : index
    %77 = vector.load %arg5[%c3, %c0_70, %c0_71] : memref<4x32x16xbf16, #tpu.memory_space<vmem>>, vector<1x32x16xbf16>
    %78 = vector.shape_cast %77 : vector<1x32x16xbf16> to vector<32x16xbf16>
    %cst_72 = arith.constant dense<0.000000e+00> : vector<32x16xf32>
    %79 = tpu.matmul %76, %78, %cst_72 {dimension_numbers = #tpu.dot_dimension_numbers<[1], [0], [0], [1], [0, 0, 1, 1], [], []>} : vector<32x32xbf16>, vector<32x16xbf16>, vector<32x16xf32> -> vector<32x16xf32>
    %cst_73 = arith.constant dense<0.000000e+00> : vector<16xf32>
    %80 = vector.multi_reduction <add>, %79, %cst_73 [0] : vector<32x16xf32> to vector<16xf32>
    %81 = vector.shape_cast %80 : vector<16xf32> to vector<1x16xf32>
    %82 = arith.addf %66, %81 : vector<1x16xf32>
    %83 = arith.mulf %79, %79 : vector<32x16xf32>
    %cst_74 = arith.constant dense<0.000000e+00> : vector<16xf32>
    %84 = vector.multi_reduction <add>, %83, %cst_74 [0] : vector<32x16xf32> to vector<16xf32>
    %85 = vector.shape_cast %84 : vector<16xf32> to vector<1x16xf32>
    %86 = arith.addf %70, %85 : vector<1x16xf32>
    %87 = arith.truncf %79 : vector<32x16xf32> to vector<32x16xbf16>
    %c0_75 = arith.constant 0 : index
    %c3_76 = arith.constant 3 : index
    %c0_77 = arith.constant 0 : index
    %c0_78 = arith.constant 0 : index
    %88 = vector.load %arg6[%c0_75, %c3_76, %c0_77, %c0_78] : memref<1x4x32x16xbf16, #tpu.memory_space<vmem>>, vector<1x1x32x16xbf16>
    %89 = vector.shape_cast %88 : vector<1x1x32x16xbf16> to vector<32x16xbf16>
    %90 = vector.shape_cast %87 : vector<32x16xbf16> to vector<1x1x32x16xbf16>
    tpu.vector_store %arg6[%c0_75, %c3_76, %c0_77, %c0_78], %90 {strides = array<i32>} : memref<1x4x32x16xbf16, #tpu.memory_space<vmem>>, vector<1x1x32x16xbf16>,
    %91 = tpu.concatenate %82, %86 in 0 : vector<1x16xf32>, vector<1x16xf32> -> vector<2x16xf32>
    %c0_79 = arith.constant 0 : index
    %c0_80 = arith.constant 0 : index
    %c0_81 = arith.constant 0 : index
    %c0_82 = arith.constant 0 : index
    %92 = vector.load %arg7[%c0_79, %c0_80, %c0_81, %c0_82] : memref<1x1x2x16xf32, #tpu.memory_space<vmem>>, vector<1x1x2x16xf32>
    %93 = vector.shape_cast %92 : vector<1x1x2x16xf32> to vector<2x16xf32>
    %94 = vector.shape_cast %91 : vector<2x16xf32> to vector<1x1x2x16xf32>
    tpu.vector_store %arg7[%c0_79, %c0_80, %c0_81, %c0_82], %94 {strides = array<i32>} : memref<1x1x2x16xf32, #tpu.memory_space<vmem>>, vector<1x1x2x16xf32>,
    return
  }
  func.func @transform_0(%arg0: i32, %arg1: i32) -> (i32, i32, i32, i32) {
    %c0_i32 = arith.constant 0 : i32
    %c0_i32_0 = arith.constant 0 : i32
    %c0_i32_1 = arith.constant 0 : i32
    return %arg0, %arg1, %c0_i32, %c0_i32_0 : i32, i32, i32, i32
  }
  func.func @transform_1(%arg0: i32, %arg1: i32) -> (i32, i32, i32, i32) {
    %c4_i32 = arith.constant 4 : i32
    %0 = arith.muli %arg1, %c4_i32 : i32
    %c1_i32 = arith.constant 1 : i32
    %1 = arith.subi %0, %c1_i32 : i32
    %c0_i32 = arith.constant 0 : i32
    %2 = arith.maxsi %1, %c0_i32 : i32
    %c0_i32_0 = arith.constant 0 : i32
    %c0_i32_1 = arith.constant 0 : i32
    %c0_i32_2 = arith.constant 0 : i32
    return %arg0, %2, %c0_i32_0, %c0_i32_1 : i32, i32, i32, i32
  }
  func.func @transform_2(%arg0: i32, %arg1: i32) -> (i32, i32, i32, i32) {
    %c4_i32 = arith.constant 4 : i32
    %0 = arith.muli %arg1, %c4_i32 : i32
    %c4_i32_0 = arith.constant 4 : i32
    %1 = arith.addi %0, %c4_i32_0 : i32
    %c7_i32 = arith.constant 7 : i32
    %2 = arith.minsi %1, %c7_i32 : i32
    %c0_i32 = arith.constant 0 : i32
    %c0_i32_1 = arith.constant 0 : i32
    %c0_i32_2 = arith.constant 0 : i32
    return %arg0, %2, %c0_i32, %c0_i32_1 : i32, i32, i32, i32
  }
  func.func @transform_3(%arg0: i32, %arg1: i32) -> (i32, i32, i32) {
    %c0_i32 = arith.constant 0 : i32
    %c0_i32_0 = arith.constant 0 : i32
    %c0_i32_1 = arith.constant 0 : i32
    %c0_i32_2 = arith.constant 0 : i32
    return %c0_i32, %c0_i32_0, %c0_i32_1 : i32, i32, i32
  }
  func.func @transform_4(%arg0: i32, %arg1: i32) -> (i32, i32, i32, i32) {
    %c0_i32 = arith.constant 0 : i32
    %c0_i32_0 = arith.constant 0 : i32
    %c0_i32_1 = arith.constant 0 : i32
    return %arg0, %c0_i32, %arg1, %c0_i32_0 : i32, i32, i32, i32
  }
  func.func @transform_5(%arg0: i32, %arg1: i32) -> (i32, i32, i32, i32) {
    %c0_i32 = arith.constant 0 : i32
    %c0_i32_0 = arith.constant 0 : i32
    %c0_i32_1 = arith.constant 0 : i32
    return %arg0, %arg1, %c0_i32, %c0_i32_0 : i32, i32, i32, i32
  }
}

</mosaic_0001>

<bundles_post_ra>
// kernel: tpu_custom_call.1
= control target key start
LH: loop header
LB: loop body
LE: loop exit
PB: predicated region body
PF: predicated region fallthrough
CT: control target
= control target key end

     0   :  { %s2802_s0 = inlined_call_operand.vmem [shape: bf16[2,8,8,8], index: 0, kind: input, shape index: {}]   ;;  %s2803_s1 = inlined_call_operand.hbm [shape: bf16[2,8,8,8], index: 1, kind: input, shape index: {}]   ;;  %s2804_s2 = inlined_call_operand.hbm [shape: bf16[2,8,8,8], index: 2, kind: input, shape index: {}]   ;;  %s2805_s3 = inlined_call_operand.vmem [shape: bf16[4,32,16], index: 3, kind: input, shape index: {}]   ;;  %s2806_s4 = inlined_call_operand.vmem [shape: bf16[2,4,64,16], index: 4, kind: output, shape index: {0}]   ;;  %s2807_s5 = inlined_call_operand.hbm [shape: f32[2,2,2,16], index: 5, kind: output, shape index: {1}]  }
   0x1   :  { %2825 = sst [smem:[#allocation22_spill]] %s2802_s0 }
   0x2   :  { %2826 = sst [smem:[#allocation23_spill]] %s2803_s1 }
   0x3   :  { %2827 = sst [smem:[#allocation24_spill]] %s2805_s3 }
   0x4   :  { %2828 = sst [smem:[#allocation25_spill]] %s2806_s4 }
   0x5   :  { %2829 = sst [smem:[#allocation26_spill]] %s2807_s5 }
   0x6   :  { %11 = vsyncpa [#allocation4], 0 }
   0x7   :  { %13 = vsyncpa [#allocation4 + $0x1], 0 }
   0x8   :  { %14 = vsyncpa [#allocation7], 0 }
   0x9   :  { %16 = vsyncpa [#allocation7 + $0x1], 0 }
   0xa   :  { %17 = vsyncpa [#allocation5], 0 }
   0xb   :  { %19 = vsyncpa [#allocation5 + $0x1], 0  ;;  %s2156_s18 = smov 0   ;;  %s2158_s19 = smov 0  }
   0xc   :  { %s2160_s20 = smov 0   ;;  %s2162_s21 = smov 0  }
   0xd   :  { %s2164_s22 = smov 0   ;;  %s2166_s23 = smov 0  }
   0xe   :  { %s2168_s24 = smov 0   ;;  %s2170_s25 = smov 0  }
   0xf   :  { %s2172_s26 = smov 0   ;;  %s2174_s27 = smov 0  }
  0x10   :  { %s2176_s28 = smov 0   ;;  %s2178_s29 = smov 0  }
  0x11   :  { %s2180_s30 = smov 0   ;;  %s2182_s6 = smov 0  }
  0x12 LB: > { %2830 = sst [smem:[#allocation13_spill]] %s2066_s18  ;;  %s1578_s7 = sadd.s32 4294967295, %s2118_s6   ;;  %s2118_s6 = sphi %s2182_s6, %s25_s6   ;;  %s2114_s30 = sphi %s2180_s30, %s2896_s30   ;;  %s2110_s29 = sphi %s2178_s29, %s2884_s29   ;;  %s2106_s28 = sphi %s2176_s28, %s2895_s28   ;;  %s2102_s27 = sphi %s2174_s27, %s2883_s27   ;;  %s2098_s26 = sphi %s2172_s26, %s2894_s26   ;;  %s2094_s25 = sphi %s2170_s25, %s2893_s25   ;;  %s2090_s24 = sphi %s2168_s24, %s2892_s24   ;;  %s2086_s23 = sphi %s2166_s23, %s2891_s23   ;;  %s2082_s22 = sphi %s2164_s22, %s2890_s22   ;;  %s2078_s21 = sphi %s2162_s21, %s2889_s21   ;;  %s2074_s20 = sphi %s2160_s20, %s2880_s20   ;;  %s2070_s19 = sphi %s2158_s19, %s2888_s19   ;;  %s2066_s18 = sphi %s2156_s18, %s2887_s18  }
  0x13   : > { %2831 = sst [smem:[#allocation14_spill]] %s2074_s20  ;;  %s34_s9 = sadd.s32 1, %s2110_s29 }
  0x14   : > { %2832 = sst [smem:[#allocation15_spill]] %s2098_s26  ;;  %s37_s10 = sadd.s32 1, %s2114_s30 }
  0x15   : > { %2833 = sst [smem:[#allocation16_spill]] %s2110_s29  ;;  %p35_p0 = scmp.ge.s32.totalorder %s34_s9, 2 }
  0x16   : > { %s2809_s11 = sshll.u32 %s2110_s29, 2  ;;  %s82_s13 = sadd.s32 1, %s2098_s26 }
  0x17   : > { %s1581_s12 = sadd.s32 4294967295, %s2809_s11  ;;  %s2898_s9 = smov (%p35_p0, %s34_s9), 0 }
  0x18   : > { %2834 = sst [smem:[#allocation17_spill]] %s2898_s9  ;;  %s2900_s10 = smov (!%p35_p0, %s37_s10), %s2114_s30 }
  0x19   : > { %p71_p1 = scmp.gt.s32.totalorder %s1581_s12, 0  ;;  %s2808_s14 = sshll.u32 %s2898_s9, 2 }
  0x1a   : > { %p39_p2 = scmp.ge.s32.totalorder %s2900_s10, 2  ;;  %s1583_s15 = sadd.s32 4294967295, %s2808_s14 }
  0x1b   : > { %s2902_s12 = smov (!%p71_p1, %s1581_s12), 0  ;;  %p75_p3 = scmp.gt.s32.totalorder %s1583_s15, 0 }
  0x1c   : > { %s2904_s10 = smov (%p39_p2, %s2900_s10), 0  ;;  %p89_p4 = scmp.ne.s32.totalorder %s2098_s26, %s2094_s25 }
  0x1d   : > { %2835 = sst [smem:[#allocation18_spill]] %s2904_s10  ;;  %s2248_s16 = ssub.s32 %s2114_s30, %s2904_s10 }
  0x1e   : > { %p2818_p5 = scmp.eq.s32.totalorder %s2118_s6, 0  ;;  %s2906_s15 = smov (!%p75_p3, %s1583_s15), 0 }
  0x1f   : > { %p95_p7 = scmp.ne.s32.totalorder %s2094_s25, %s2090_s24  ;;  %s78_s14 = ssub.s32 %s2902_s12, %s2906_s15 }
  0x20   : > { %p2253_p6 = por %p2818_p5, %p89_p4  ;;  %p2262_p8 = scmp.eq.s32.totalorder %s1578_s7, 0 }
  0x21   : > { %s79_s8 = sor.u32 %s78_s14, %s2248_s16  ;;  %s163_s10 = ssub.s32 %s2110_s29, %s2898_s9 }
  0x22   : > { %p80_p9 = scmp.eq.s32.totalorder %s79_s8, 0  ;;  %p2271_p10 = por %p2262_p8, %p95_p7 }
  0x23   : > { %s164_s24 = sor.u32 %s163_s10, %s2248_s16  ;;  %s167_s15 = sadd.s32 1, %s2074_s20 }
  0x24   : > { %s2838_s5 = scalar_select %p2271_p10, 1, 0 }
  0x25   : > { %s2278_s4 = scalar_select %p80_p9, %s2098_s26, %s82_s13  }
  0x26   : > { %p165_p11 = scmp.eq.s32.totalorder %s164_s24, 0  ;;  %p177_p12 = scmp.ne.s32.totalorder %s2074_s20, %s2070_s19 }
  0x27   : > { %2839 = sst [smem:[#allocation19_spill]] %s2278_s4  ;;  %p178_p13 = scmp.eq.s32.totalorder %s1578_s7, 3 }
  0x28   : > { %p211_p0 = scmp.ne.s32.totalorder %s2070_s19, %s2066_s18  ;;  %s2843_s3 = sadd.s32 4294967294, %s2118_s6  }
  0x29   : > { %s2287_s8 = scalar_select %p165_p11, %s2074_s20, %s167_s15  }
  0x2a   : > { %p2289_p1 = por %p178_p13, %p177_p12  ;;  %p212_p2 = scmp.eq.s32.totalorder %s2843_s3, 3 }
  0x2b   : > { %2840 = sst [smem:[#allocation20_spill]] %s2287_s8  ;;  %p2817_p3 = scmp.lt.s32.totalorder %s2118_s6, 4 }
  0x2c   : > { %s2841_s14 = scalar_select %p2289_p1, 1, 0 }
  0x2d   : > { %p2296_p4 = por %p212_p2, %p211_p0  ;;  %s248_s13 = sand.u32 1, %s2098_s26  }
  0x2e   : > { %2842 = sst [smem:[#allocation21_spill]] %s2841_s14  ;;  %s1588_s7 = sshll.u32 %s248_s13, 2 }
  0x2f   : > { %s2844_s10 = scalar_select %p2296_p4, 1, 0 }
  0x30   : > { %s1591_s24 = sshll.u32 %s2114_s30, 3  ;;  %s252_s18 = scalar_lea.vmem [#allocation3], %s1588_s7 }
  0x31   : > { %s261_s4 = sadd.s32 %s1591_s24, %s2902_s12  ;;  %s265_s15 = sshll.u32 %s252_s18, 4  ;;  %s2305_s15 = int_to_ptr.vmem [resolvable:$true] %s265_s15 }
  0x32   : > { %s1592_s8 = sshll.u32 %s261_s4, 6  ;;  %s2845_s1 = sld [smem:[#allocation23_spill]] }
  0x33   : > { %p2316_p7 = pnand %p2817_p3, %p2253_p6  ;;  %s249_s4 = scalar_lea.sflag [#allocation4], %s248_s13 }
  0x35   : > { %p1910_p13 = pneg %p2316_p7 }
  0x38   : > { %s2310_s14 = scalar_lea.hbm %s2845_s1, %s1592_s8  ;;  %s1913_s12 = scalar_lea.hbm %s2845_s1, 1024 }
  0x39   : > { %s1908_s18 = scalar_lea.hbm %s2310_s14, 64  ;;  %p1914_p6 = scmp.lt.u32.totalorder %s2310_s14, %s2845_s1 }
  0x3a   : > { %p1909_p12 = scmp.ne.s32.totalorder %s2310_s14, %s1908_s18  ;;  %p1915_p3 = scmp.lt.u32.totalorder %s1913_s12, %s1908_s18 }
  0x3b   : > { %p1917_p9 = scmp.lt.u32.totalorder %s1908_s18, %s2310_s14 }
  0x3c   : > { %p1911_p0 = pnand %p1910_p13, %p1909_p12  ;;  %p1916_p5 = por %p1915_p3, %p1914_p6 }
  0x3e   : > { %p1912_p2 = pneg %p1911_p0  ;;  %p1918_p11 = por %p1917_p9, %p1916_p5 }
  0x40   : > { %p1919_p4 = pnand %p1918_p11, %p1912_p2 }
  0x42   : > { %1922 = shalt.err (!%p1919_p4)
}
  0x43   : > { %s1923_s13 = scalar_lea.vmem %s2305_s15, 64  ;;  %s2120_s7 = smov [#allocation3]  }
  0x44   : > { %p1924_p12 = scmp.ne.s32.totalorder %s2305_s15, %s1923_s13  ;;  %s1928_s0 = sshll.u32 %s2120_s7, 4  ;;  %s1929_s0 = int_to_ptr.vmem [resolvable:$false] %s1928_s0 }
  0x45   : > { %s1930_s20 = scalar_lea.vmem %s1929_s0, 128  ;;  %p1931_p10 = scmp.lt.s32.totalorder %s2305_s15, %s1929_s0 }
  0x46   : > { %p1926_p0 = pnand %p1924_p12, %p1910_p13  ;;  %p1932_p3 = scmp.lt.s32.totalorder %s1930_s20, %s1923_s13 }
  0x48   : > { %p1927_p1 = pneg %p1926_p0  ;;  %p1933_p6 = por %p1932_p3, %p1931_p10 }
  0x4a   : > { %p1934_p5 = pnand %p1933_p6, %p1927_p1 }
  0x4c   : > { %1937 = shalt.err (!%p1934_p5)
}
  0x4d   : > { %1769 = dma.hbm_to_vmem [thread:$0]  (!%p2316_p7), %s2310_s14, 64, %s2305_s15, %s249_s4  }
  0x4e   : > { %p2847_p10 = scmp.lt.s32.totalorder %s2118_s6, 5  ;;  %p2848_p1 = scmp.ge.s32.totalorder %s2118_s6, 1 }
  0x4f   : > { %s2850_s18 = sshll.u32 %s2110_s29, 2  ;;  %s2851_s17 = sshll.u32 %s2898_s9, 2 }
  0x50   : > { %p2351_p4 = pnand %p2848_p1, %p2847_p10  ;;  %s106_s12 = sadd.s32 4, %s2850_s18 }
  0x51   : > { %s110_s8 = sadd.s32 4, %s2851_s17  ;;  %p107_p9 = scmp.lt.s32.totalorder %s106_s12, 7 }
  0x52   : > { %p111_p11 = scmp.lt.s32.totalorder %s110_s8, 7  ;;  %s118_s13 = sadd.s32 1, %s2086_s23 }
  0x53   : > { %p125_p13 = scmp.ne.s32.totalorder %s2086_s23, %s2082_s22  ;;  %s2908_s12 = smov (!%p107_p9, %s106_s12), 7 }
  0x54   : > { %s2910_s8 = smov (!%p111_p11, %s110_s8), 7  ;;  %p2852_p2 = scmp.eq.s32.totalorder %s2118_s6, 0 }
  0x55   : > { %p131_p12 = scmp.ne.s32.totalorder %s2082_s22, %s2078_s21  ;;  %s114_s15 = ssub.s32 %s2908_s12, %s2910_s8 }
  0x56   : > { %p2364_p7 = por %p125_p13, %p2852_p2  ;;  %s272_s4 = sand.u32 1, %s2086_s23  }
  0x57   : > { %s115_s7 = sor.u32 %s114_s15, %s2248_s16  ;;  %p2374_p0 = por %p131_p12, %p2262_p8 }
  0x58   : > { %p116_p3 = scmp.eq.s32.totalorder %s115_s7, 0  ;;  %s1593_s20 = sshll.u32 %s272_s4, 2 }
  0x59   : > { %s2854_s0 = scalar_select %p2374_p0, 1, 0 }
  0x5a   : > { %s285_s18 = sadd.s32 %s1591_s24, %s2908_s12  ;;  %s276_s21 = scalar_lea.vmem [#allocation6], %s1593_s20 }
  0x5b   : > { %s2381_s17 = scalar_select %p116_p3, %s2086_s23, %s118_s13  }
  0x5c   : > { %s1596_s1 = sshll.u32 %s285_s18, 6  ;;  %s289_s11 = sshll.u32 %s276_s21, 4  ;;  %s2388_s11 = int_to_ptr.vmem [resolvable:$true] %s289_s11 }
  0x5d   : > { %s2386_s26 = scalar_lea.hbm %s2804_s2, %s1596_s1  ;;  %p2855_p8 = scmp.lt.s32.totalorder %s2118_s6, 4 }
  0x5e   : > { %s273_s24 = scalar_lea.sflag [#allocation7], %s272_s4  ;;  %s1938_s29 = scalar_lea.hbm %s2386_s26, 64 }
  0x5f   : > { %p2394_p6 = pnand %p2855_p8, %p2364_p7  ;;  %p1939_p5 = scmp.ne.s32.totalorder %s2386_s26, %s1938_s29 }
  0x60   : > { %s1943_s12 = scalar_lea.hbm %s2804_s2, 1024  ;;  %p1944_p11 = scmp.lt.u32.totalorder %s2386_s26, %s2804_s2 }
  0x61   : > { %p1940_p10 = pneg %p2394_p6  ;;  %p1945_p13 = scmp.lt.u32.totalorder %s1943_s12, %s1938_s29 }
  0x62   : > { %p1947_p7 = scmp.lt.u32.totalorder %s1938_s29, %s2386_s26 }
  0x63   : > { %p1941_p1 = pnand %p1940_p10, %p1939_p5  ;;  %p1946_p2 = por %p1945_p13, %p1944_p11 }
  0x65   : > { %p1942_p9 = pneg %p1941_p1  ;;  %p1948_p12 = por %p1947_p7, %p1946_p2 }
  0x67   : > { %p1949_p3 = pnand %p1948_p12, %p1942_p9 }
  0x69   : > { %1952 = shalt.err (!%p1949_p3)
}
  0x6a   : > { %s1953_s14 = scalar_lea.vmem %s2388_s11, 64  ;;  %s2121_s15 = smov [#allocation6]  }
  0x6b   : > { %p1954_p8 = scmp.ne.s32.totalorder %s2388_s11, %s1953_s14  ;;  %s1958_s4 = sshll.u32 %s2121_s15, 4  ;;  %s1959_s4 = int_to_ptr.vmem [resolvable:$false] %s1958_s4 }
  0x6c   : > { %s1960_s7 = scalar_lea.vmem %s1959_s4, 128  ;;  %p1961_p0 = scmp.lt.s32.totalorder %s2388_s11, %s1959_s4 }
  0x6d   : > { %p1956_p5 = pnand %p1954_p8, %p1940_p10  ;;  %p1962_p11 = scmp.lt.s32.totalorder %s1960_s7, %s1953_s14 }
  0x6f   : > { %p1957_p1 = pneg %p1956_p5  ;;  %p1963_p13 = por %p1962_p11, %p1961_p0 }
  0x71   : > { %p1964_p2 = pnand %p1963_p13, %p1957_p1 }
  0x73   : > { %1967 = shalt.err (!%p1964_p2)
}
  0x74   : > { %1772 = dma.hbm_to_vmem [thread:$0]  (!%p2394_p6), %s2386_s26, 64, %s2388_s11, %s273_s24  }
  0x75   : > { %298 = sbr.rel (%p2351_p4) target bundleno = 606 (0x25e), region = 36  ;;  %s300_s20 = sand.u32 (!%p2351_p4), 1, %s2094_s25  }
  0x76   : > { %s2426_s18 = sshll.u32 (!%p2351_p4), %s300_s20, 2  ;;  %s301_s21 = scalar_lea.sflag (!%p2351_p4), [#allocation4], %s300_s20 }
  0x77   : > { %s304_s29 = scalar_lea.vmem (!%p2351_p4), [#allocation3], %s2426_s18  ;;  %p2857_p10 = scmp.ne.s32.totalorder (!%p2351_p4), %s2838_s5, 0 }
  0x7c   : > { %2053 = dma.done.wait (%p2857_p10), %s301_s21, 64  }
  0x7d   : > { %2055 = vsyncadd (%p2857_p10), %s301_s21, 4294967232  ;;  %s309_s16 = sand.u32 1, %s2082_s22   ;;  %p2858_p4 = scmp.ne.s32.totalorder %s2854_s0, 0 }
  0x7e   : > { %s2434_s26 = sshll.u32 %s309_s16, 2  ;;  %s310_s3 = scalar_lea.sflag [#allocation7], %s309_s16 }
  0x7f   : > { %s313_s11 = scalar_lea.vmem [#allocation6], %s2434_s26 }
  0x80   : > { %2057 = dma.done.wait (%p2858_p4), %s310_s3, 64  }
  0x81   : > { %2059 = vsyncadd (%p2858_p4), %s310_s3, 4294967232  ;;  %s2442_s24 = sand.u32 1, %s2070_s19   ;;  %vm378_vm0 = vcmask 57344   ;;  %vm379_vm1 = vsmask.f32 256  ;;  %s2447_s9 = sshll.u32 %s2102_s27, 2 }
  0x82   : > { %s1600_s5 = sshll.u32 %s2442_s24, 6  ;;  %s1601_s1 = sshll.u32 %s2442_s24, 1  ;;  %vm2451_vm2 = vmand %vm378_vm0, %vm379_vm1  ;;  %vm399_vm3 = vcmask 64516   ;;  %vm400_vm4 = vsmask.f32 7954  ;;  %vm432_vm6 = vcmask 61440  }
  0x83   : > { %p359_p0 = scmp.lt.s32.totalorder %s2106_s28, 1  ;;  %p361_p6 = scmp.lt.s32.totalorder %s2447_s9, 7  ;;  %v381_v1 = vld [vmem:[#allocation2] sm:$0x1]  ;;  %v384_v2 = vld [vmem:[#allocation2 + $0x8] sm:$0x1]  ;;  %vm2465_vm5 = vmand %vm399_vm3, %vm400_vm4 }
  0x84   : > { %v387_v3 = vld [vmem:[#allocation2 + $0x10] sm:$0x1]  ;;  %v382_v4 = vsel %vm2451_vm2, 0, %v381_v1  ;;  %v385_v5 = vsel %vm2451_vm2, 0, %v384_v2  ;;  %v390_v7 = vld [vmem:[#allocation2 + $0x18] sm:$0x1] }
  0x85   : > { %s2456_s0 = scalar_select %p359_p0, %s2106_s28, 1  ;;  %v388_v6 = vsel %vm2451_vm2, 0, %v387_v3  ;;  %383 = vst [vmem:[#allocation2] sm:$0x1] %v382_v4  ;;  %386 = vst [vmem:[#allocation2 + $0x8] sm:$0x1] %v385_v5 }
  0x86   : > { %s362_s12 = scalar_select %p361_p6, %s2447_s9, 7  ;;  %389 = vst [vmem:[#allocation2 + $0x10] sm:$0x1] %v388_v6  ;;  %v391_v9 = vsel %vm2451_vm2, 0, %v390_v7  ;;  %v393_v10 = vld [vmem:[#allocation2 + $0x20] sm:$0x1] }
  0x87   : > { %s1603_s8 = sshll.u32 %s2456_s0, 3  ;;  %v396_v11 = vld [vmem:[#allocation2 + $0x28] sm:$0x1]  ;;  %392 = vst [vmem:[#allocation2 + $0x18] sm:$0x1] %v391_v9  ;;  %v394_v12 = vsel %vm2451_vm2, 0, %v393_v10 }
  0x88   : > { %v397_v13 = vsel %vm2451_vm2, 0, %v396_v11  ;;  %v402_v14 = vld [vmem:[#allocation2] sm:$0xf0]  ;;  %v405_v15 = vld [vmem:[#allocation2 + $0x8] sm:$0xf0]  ;;  %s364_s13 = sadd.s32 %s1603_s8, %s362_s12  ;;  %s2863_s7 = sld [smem:[#allocation22_spill]] }
  0x89   : > { %395 = vst [vmem:[#allocation2 + $0x20] sm:$0x1] %v394_v12  ;;  %398 = vst [vmem:[#allocation2 + $0x28] sm:$0x1] %v397_v13  ;;  %v403_v16 = vsel %vm2465_vm5, 0, %v402_v14  ;;  %v406_v17 = vsel %vm2465_vm5, 0, %v405_v15 }
  0x8a   : > { %v408_v18 = vld [vmem:[#allocation2 + $0x10] sm:$0xf0]  ;;  %v411_v19 = vld [vmem:[#allocation2 + $0x18] sm:$0xf0]  ;;  %404 = vst [vmem:[#allocation2] sm:$0xf0] %v403_v16 }
  0x8b   : > { %407 = vst [vmem:[#allocation2 + $0x8] sm:$0xf0] %v406_v17  ;;  %v409_v20 = vsel %vm2465_vm5, 0, %v408_v18  ;;  %v412_v21 = vsel %vm2465_vm5, 0, %v411_v19  ;;  %v414_v22 = vld [vmem:[#allocation2 + $0x20] sm:$0xf0] }
  0x8c   : > { %v417_v23 = vld [vmem:[#allocation2 + $0x28] sm:$0xf0]  ;;  %410 = vst [vmem:[#allocation2 + $0x10] sm:$0xf0] %v409_v20  ;;  %413 = vst [vmem:[#allocation2 + $0x18] sm:$0xf0] %v412_v21 }
  0x8d   : > { %v415_v24 = vsel %vm2465_vm5, 0, %v414_v22  ;;  %v418_v25 = vsel %vm2465_vm5, 0, %v417_v23  ;;  %v1894_v26 = vld [vmem:[%s304_s29] ss:$0 sps:$4 sm:$0xff]   ;;  %s1604_s14 = sshll.u32 %s364_s13, 2  ;;  %s2513_s18 = scalar_lea.vmem [#allocation8], %s1600_s5 }
  0x8e   : > { %416 = vst [vmem:[#allocation2 + $0x20] sm:$0xf0] %v415_v24  ;;  %419 = vst [vmem:[#allocation2 + $0x28] sm:$0xf0] %v418_v25  ;;  %v1899_v27 = vld [vmem:[%s313_s11] ss:$0 sps:$4 sm:$0xff]   ;;  %s366_s20 = scalar_lea.vmem %s2863_s7, %s1604_s14 }
  0x8f   : > { %v425_v28 = vshrl.u32 %v1894_v26, 16  ;;  %v428_v29 = vshll.u32 %v1894_v26, 16  ;;  %vm433_vm7 = vsmask.f32 4354  ;;  %v1895_v30 = vld [vmem:[%s366_s20] ss:$0 sps:$4 sm:$0xff]  }
  0x90   : > { %v1896_v32 = vld [vmem:[%s366_s20 + $0x4] ss:$0 sps:$4 sm:$0xff]   ;;  %v504_v33 = vshrl.u32 %v1899_v27, 16  ;;  %vm2495_vm8 = vmand %vm432_vm6, %vm433_vm7  ;;  %v455_v35 = vshrl.u32 %v1895_v30, 16  ;;  %v458_v36 = vshll.u32 %v1895_v30, 16  ;;  %v507_v50 = vshll.u32 %v1899_v27, 16 }
  0x91   : > { %v427_v31 = vrot.slane %v425_v28, 7  ;;  %v1897_v37 = vld [vmem:[%s366_s20 + $0x8] ss:$0 sps:$4 sm:$0xff]   ;;  %v435_v39 = vld [vmem:[#allocation2] sm:$0x1f]  ;;  %v462_v40 = vshrl.u32 %v1896_v32, 16 }
  0x92   : > { %v465_v41 = vshll.u32 %v1896_v32, 16  ;;  %v457_v42 = vrot.slane %v455_v35, 7  ;;  %v469_v43 = vshrl.u32 %v1897_v37, 16  ;;  %v472_v44 = vshll.u32 %v1897_v37, 16  ;;  %v487_v47 = vld [vmem:[#allocation2 + $0x8] sm:$0x1f] }
  0x93   : > { %v430_v38 = vor.u32 %v428_v29, %v427_v31  ;;  %v506_v45 = vrot.slane %v504_v33, 7  ;;  %v464_v48 = vrot.slane %v462_v40, 7  ;;  %v1898_v49 = vld [vmem:[%s366_s20 + $0xc] ss:$0 sps:$4 sm:$0xff]   ;;  %v490_v52 = vld [vmem:[#allocation2 + $0x10] sm:$0x1f] }
  0x94   : > { %v460_v51 = vor.u32 %v458_v36, %v457_v42  ;;  %v471_v53 = vrot.slane %v469_v43, 7  ;;  %v493_v56 = vld [vmem:[#allocation2 + $0x18] sm:$0x1f]  ;;  %v476_v57 = vshrl.u32 %v1898_v49, 16  ;;  %v479_v58 = vshll.u32 %v1898_v49, 16  ;;  %s2517_s21 = scalar_lea.vmem [#allocation9], %s1601_s1 }
  0x95   : > { %v436_v46 = vsel %vm2495_vm8, %v430_v38, %v435_v39  ;;  %v512_v54 = vld [vmem:[#allocation2 + $0x28] sm:$0x1f]  ;;  %v467_v55 = vor.u32 %v465_v41, %v464_v48  ;;  %v509_v59 = vor.u32 %v507_v50, %v506_v45  ;;  %v496_v2 = vld [vmem:[#allocation2 + $0x20] sm:$0x1f]  ;;  %p1611_p9 = scmp.ne.s32.totalorder %s2102_s27, 0 }
  0x96   : > { %437 = vst [vmem:[#allocation2] sm:$0x1f] %v436_v46  ;;  %v488_v60 = vsel %vm2495_vm8, %v460_v51, %v487_v47  ;;  %v474_v61 = vor.u32 %v472_v44, %v471_v53  ;;  %v478_v63 = vrot.slane %v476_v57, 7 }
  0x97   : > { %489 = vst [vmem:[#allocation2 + $0x8] sm:$0x1f] %v488_v60  ;;  %v491_v62 = vsel %vm2495_vm8, %v467_v55, %v490_v52  ;;  %v513_v0 = vsel %vm2495_vm8, %v509_v59, %v512_v54  ;;  %518 = sbr.rel (%p1611_p9) target bundleno = 160 (0xa0), region = 48 }
  0x98   : > { %492 = vst [vmem:[#allocation2 + $0x10] sm:$0x1f] %v491_v62  ;;  %v494_v1 = vsel %vm2495_vm8, %v474_v61, %v493_v56  ;;  %514 = vst [vmem:[#allocation2 + $0x28] sm:$0x1f] %v513_v0  ;;  %v481_v3 = vor.u32 %v479_v58, %v478_v63 }
  0x99   : > { %495 = vst [vmem:[#allocation2 + $0x18] sm:$0x1f] %v494_v1 }
  0x9a   : > { %v497_v4 = vsel %vm2495_vm8, %v481_v3, %v496_v2 }
  0x9b   : > { %498 = vst [vmem:[#allocation2 + $0x20] sm:$0x1f] %v497_v4 }
  0x9d   : > { %v519_v5 = vld [vmem:[#allocation2] sm:$0x1f] (!%p1611_p9) }
  0x9e   : > { %v520_v6 = vsel %vm2495_vm8, 0, %v519_v5 }
  0x9f   : > { %521 = vst [vmem:[#allocation2] sm:$0x1f] %v520_v6 }
  0xa0 PF: > { %p1612_p7 = scmp.ne.s32.totalorder %s2102_s27, 1 }
  0xa1   : > { %v526_v7 = vld [vmem:[#allocation2 + $0x28] sm:$0x1f] (!%p1612_p7) }
  0xa2   : > { %525 = sbr.rel (%p1612_p7) target bundleno = 169 (0xa9), region = 52  ;;  %v527_v8 = vsel (!%p1612_p7), %vm2495_vm8, 0, %v526_v7 }
  0xa3   : > { %528 = vst [vmem:[#allocation2 + $0x28] sm:$0x1f] (!%p1612_p7), %v527_v8 }
  0xa9 PF: > { %v2525_v9 = vld [vmem:[#allocation2 + $0x10] sm:$0x1f]  ;;  %v2527_v10 = vld [vmem:[#allocation2] sm:$0x1f]  ;;  %v2533_v15 = vld [vmem:[#allocation2 + $0x18] sm:$0x1f] }
  0xaa   : > { %v554_v11 = vshrl.u32 %v2525_v9, 16  ;;  %v556_v12 = vshll.u32 %v2525_v9, 16  ;;  %v540_v13 = vshrl.u32 %v2527_v10, 16  ;;  %v542_v14 = vshll.u32 %v2527_v10, 16  ;;  %v2537_v18 = vld [vmem:[#allocation2 + $0x8] sm:$0x1f] }
  0xab   : > { %v561_v16 = vshrl.u32 %v2533_v15, 16  ;;  %v563_v17 = vshll.u32 %v2533_v15, 16  ;;  %v547_v21 = vshrl.u32 %v2537_v18, 16  ;;  %v549_v22 = vshll.u32 %v2537_v18, 16  ;;  %s2866_s26 = sld [smem:[#allocation24_spill]]  ;;  %s2122_s11 = smov 8  }
  0xac   : > { %v558_v19 = vrot.slane %v556_v12, 1  ;;  %v544_v20 = vrot.slane %v542_v14, 1  ;;  %v535_v30 = vld [vmem:[#allocation2 + $0x10] sm:$0x1f]  ;;  %v534_v32 = vld [vmem:[#allocation2 + $0x8] sm:$0x1f] }
  0xad   : > { %v565_v23 = vrot.slane %v563_v17, 1  ;;  %v551_v26 = vrot.slane %v549_v22, 1  ;;  %v609_v31 = vshll.u32 %v535_v30, 16  ;;  %v537_v33 = vld [vmem:[#allocation2 + $0x20] sm:$0x1f]  ;;  %v607_v34 = vshrl.u32 %v535_v30, 16 }
  0xae   : > { %v559_v24 = vor.u32 %v558_v19, %v554_v11  ;;  %v545_v25 = vor.u32 %v544_v20, %v540_v13  ;;  %v602_v35 = vshll.u32 %v534_v32, 16  ;;  %v600_v36 = vshrl.u32 %v534_v32, 16  ;;  %v536_v37 = vld [vmem:[#allocation2 + $0x18] sm:$0x1f]  ;;  %s2123_s0 = smov 16   ;;  %s2124_s15 = smov 24  }
  0xaf   : > { %v566_v28 = vor.u32 %v565_v23, %v561_v16  ;;  %v552_v29 = vor.u32 %v551_v26, %v547_v21  ;;  %v611_v39 = vrot.slane %v609_v31, 1  ;;  %v623_v40 = vshll.u32 %v537_v33, 16  ;;  %v2553_v43 = vld [vmem:[#allocation2 + $0x20] sm:$0x1f]  ;;  %v538_v52 = vld [vmem:[#allocation2 + $0x28] sm:$0x1f] }
  0xb0   : > { %578 = vrot.lane.b32.xlu1 %v559_v24, %s2122_s11  ;;  %574 = vrot.lane.b32.xlu0 %v545_v25, %s2122_s11  ;;  %v604_v41 = vrot.slane %v602_v35, 1  ;;  %v616_v42 = vshll.u32 %v536_v37, 16  ;;  %v621_v45 = vshrl.u32 %v537_v33, 16  ;;  %v614_v47 = vshrl.u32 %v536_v37, 16  ;;  %s1297_s1 = scalar_lea.sflag [#allocation5], %s2442_s24 }
  0xb1   : > { %s2867_s3 = smov %s2866_s26  ;;  %v1900_v27 = vld [vmem:[%s2866_s26] sm:$0xff]   ;;  %v625_v46 = vrot.slane %v623_v40, 1  ;;  %v612_v49 = vor.u32 %v611_v39, %v607_v34  ;;  %v570_v51 = vshll.u32 %v2553_v43, 16  ;;  %v568_v54 = vshrl.u32 %v2553_v43, 16 }
  0xb2   : > { %1728 = vmatprep.subr.bf16.mxu0 %v1900_v27  ;;  %v1901_v38 = vld [vmem:[%s2867_s3 + $0x8] sm:$0xff]   ;;  %v2558_v44 = vld [vmem:[%s2867_s3 + $0x20] sm:$0xff]   ;;  %v618_v48 = vrot.slane %v616_v42, 1  ;;  %v605_v50 = vor.u32 %v604_v41, %v600_v36  ;;  %v1903_v53 = vld [vmem:[%s2867_s3 + $0x10] sm:$0xff]   ;;  %v630_v58 = vshll.u32 %v538_v52, 16  ;;  %v628_v61 = vshrl.u32 %v538_v52, 16 }
  0xb3   : > { %1729 = vmatpush3.bf16.msra.mxu0 %v1900_v27  ;;  %1736 = vmatprep.subr.bf16.mxu1 %v1903_v53  ;;  %v626_v55 = vor.u32 %v625_v46, %v621_v45  ;;  %v572_v57 = vrot.slane %v570_v51, 1  ;;  %v1905_v59 = vld [vmem:[%s2867_s3 + $0x18] sm:$0xff]   ;;  %v2574_v63 = vld [vmem:[%s2867_s3 + $0x30] sm:$0xff]   ;;  %vm644_vm9 = vcmask 64512   ;;  %vm655_vm10 = vcmask 130048  }
  0xb4   : > { %580 = vrot.lane.b32.xlu1 %v566_v28, %s2122_s11  ;;  %576 = vrot.lane.b32.xlu0 %v552_v29, %s2122_s11  ;;  %v619_v56 = vor.u32 %v618_v48, %v614_v47  ;;  %v632_v62 = vrot.slane %v630_v58, 1  ;;  %vm666_vm11 = vcmask 195584   ;;  %vm703_vm12 = vcmask 261120   ;;  %v1904_v48 = vld [vmem:[%s2867_s3 + $0x28] sm:$0xff]  }
  0xb5   : > { %1730 = vmatprep.subr.bf16.mxu0 %v1901_v38  ;;  %1737 = vmatpush3.bf16.msra.mxu1 %v1903_v53  ;;  %v573_v60 = vor.u32 %v572_v57, %v568_v54  ;;  %vm824_vm13 = vsmask.f32 3328  ;;  %vm825_vm14 = vsmask.f32 7440  ;;  %vm807_vm0 = vcmask 125952  }
  0xb6   : > { %1738 = vmatprep.subr.bf16.mxu1 %v1905_v59  ;;  %v633_v0 = vor.u32 %v632_v62, %v628_v61  ;;  %vm2614_vm15 = vmor %vm824_vm13, %vm825_vm14  ;;  %vm1288_vm1 = vcmask 1040384   ;;  %vm1290_vm2 = vcmask 123904  }
  0xb7   : > { %1731 = vmatpush3.bf16.msra.mxu0 %v1901_v38 }
  0xb8   : > { %591 = vrot.lane.b32.xlu1 %v535_v30, %s2123_s0  ;;  %589 = vrot.lane.b32.xlu0 %v534_v32, %s2123_s0 }
  0xb9   : > { %1744 = vmatprep.subr.bf16.mxu0 %v2558_v44  ;;  %1739 = vmatpush3.bf16.msra.mxu1 %v1905_v59 }
  0xba   : > { %1752 = vmatprep.subr.bf16.mxu1 %v2574_v63 }
  0xbc   : > { %595 = vrot.lane.b32.xlu1 %v537_v33, %s2123_s0  ;;  %593 = vrot.lane.b32.xlu0 %v536_v37, %s2123_s0 }
  0xc0   : > { %636 = vrot.lane.b32.xlu1 %v612_v49, %s2124_s15  ;;  %634 = vrot.lane.b32.xlu0 %v605_v50, %s2124_s15 }
  0xc4   : > { %640 = vrot.lane.b32.xlu1 %v626_v55, %s2124_s15  ;;  %638 = vrot.lane.b32.xlu0 %v619_v56, %s2124_s15 }
  0xc8   : > { %582 = vrot.lane.b32.xlu0 %v573_v60, %s2122_s11  ;;  %597 = vrot.lane.b32.xlu1 %v538_v52, %s2123_s0  ;;  %s2870_s0 = sld [smem:[#allocation21_spill]] }
  0xcc   : > { %642 = vrot.lane.b32.xlu0 %v633_v0, %s2124_s15 }
  0xce   : > { %p2871_p12 = scmp.ne.s32.totalorder %s2870_s0, 0 }
  0xcf   : > { %s1690_s12 = sshll.u32 (%p2871_p12), %s2106_s28, 5  ;;  %s2872_s4 = sld [smem:[#allocation25_spill]] (%p2871_p12) }
  0xd0   : > { %s1306_s8 = sadd.s32 (%p2871_p12), %s1690_s12, %s2447_s9 }
  0xd1   : > { %s1691_s13 = sshll.u32 (%p2871_p12), %s1306_s8, 2 }
  0xd5   : > { %s1308_s7 = scalar_lea.vmem (%p2871_p12), %s2872_s4, %s1691_s13 }
 0x122   : > { %v579_v1 = vpop.permute.xlu1 %578  ;;  %v575_v2 = vpop.permute.xlu0 %574 }
 0x123   : > { %v646_v11 = vsel %vm644_vm9, %v2527_v10, %v575_v2 }
 0x126   : > { %v581_v3 = vpop.permute.xlu1 %580  ;;  %v577_v4 = vpop.permute.xlu0 %576 }
 0x127   : > { %v648_v12 = vsel %vm644_vm9, %v2537_v18, %v577_v4  ;;  %v652_v19 = vsel %vm644_vm9, %v2533_v15, %v581_v3  ;;  %v650_v18 = vsel %vm644_vm9, %v2525_v9, %v579_v1 }
 0x12a   : > { %v592_v5 = vpop.permute.xlu1 %591  ;;  %v590_v6 = vpop.permute.xlu0 %589 }
 0x12b   : > { %v659_v13 = vsel %vm655_vm10, %v648_v12, %v592_v5  ;;  %v657_v14 = vsel %vm655_vm10, %v646_v11, %v590_v6 }
 0x12e   : > { %v596_v7 = vpop.permute.xlu1 %595  ;;  %v594_v8 = vpop.permute.xlu0 %593 }
 0x12f   : > { %v663_v25 = vsel %vm655_vm10, %v652_v19, %v596_v7  ;;  %v661_v27 = vsel %vm655_vm10, %v650_v18, %v594_v8 }
 0x132   : > { %v637_v16 = vpop.permute.xlu1 %636  ;;  %v635_v17 = vpop.permute.xlu0 %634 }
 0x133   : > { %v670_v20 = vsel %vm666_vm11, %v659_v13, %v637_v16  ;;  %v668_v21 = vsel %vm666_vm11, %v657_v14, %v635_v17 }
 0x134   : > { %v1625_v22 = vcombine.low %v670_v20, %v670_v20  ;;  %v1626_v23 = vcombine.high %v670_v20, %v670_v20  ;;  %v1623_v10 = vcombine.low %v668_v21, %v668_v21  ;;  %v1624_v24 = vcombine.high %v668_v21, %v668_v21 }
 0x135   : > { %v1613_v26 = vcombine.low %v668_v21, %v670_v20 }
 0x136   : > { %v842_v28 = vshrl.u32 %v1625_v22, 16  ;;  %v845_v29 = vshll.u32 %v1625_v22, 16  ;;  %v828_v15 = vshrl.u32 %v1623_v10, 16  ;;  %v641_v30 = vpop.permute.xlu1 %640  ;;  %v639_v31 = vpop.permute.xlu0 %638  ;;  %v831_v32 = vshll.u32 %v1623_v10, 16 }
 0x137   : > { %v2594_v33 = vsel %vm666_vm11, %v663_v25, %v641_v30  ;;  %1732 = vmatprep.mubr.msk.bf16.mxu0 %vm703_vm12, %v1613_v26  ;;  %v672_v34 = vsel %vm666_vm11, %v661_v27, %v639_v31  ;;  %v851_v35 = vshll.u32 %v1626_v23, 16  ;;  %v837_v36 = vshll.u32 %v1624_v24, 16  ;;  %v1907_v30 = vld [vmem:[%s2867_s3 + $0x38] sm:$0xff]  }
 0x138   : > { %v844_v9 = vrot.slane %v842_v28, 4  ;;  %v830_v37 = vrot.slane %v828_v15, 4  ;;  %v833_v38 = vrot.slane %v831_v32, 5  ;;  %v1629_v39 = vcombine.low %v2594_v33, %v2594_v33 }
 0x139   : > { %v1630_v40 = vcombine.high %v2594_v33, %v2594_v33  ;;  %v847_v41 = vrot.slane %v845_v29, 5  ;;  %v1614_v42 = vcombine.low %v672_v34, %v2594_v33  ;;  %v1627_v45 = vcombine.low %v672_v34, %v672_v34 }
 0x13a   : > { %v1653_v46 = vcombine.low %v670_v20, %v672_v34  ;;  %v583_v47 = vpop.permute.xlu0 %582  ;;  %v870_v49 = vshrl.u32 %v1629_v39, 16  ;;  %v873_v50 = vshll.u32 %v1629_v39, 16  ;;  %v1628_v51 = vcombine.high %v672_v34, %v672_v34  ;;  %v598_v53 = vpop.permute.xlu1 %597 }
 0x13b   : > { %v654_v52 = vsel %vm644_vm9, %v2553_v43, %v583_v47  ;;  %v853_v54 = vrot.slane %v851_v35, 5  ;;  %v839_v55 = vrot.slane %v837_v36, 5  ;;  %v856_v56 = vshrl.u32 %v1627_v45, 16  ;;  %1733 = vmatmul.mubr.msk.bf16.vlgmr.msra.gmra.mrb[0].mxu0 %vm703_vm12, %v1614_v42 }
 0x13c   : > { %v859_v57 = vshll.u32 %v1627_v45, 16  ;;  %v872_v58 = vrot.slane %v870_v49, 4  ;;  %v875_v59 = vrot.slane %v873_v50, 5  ;;  %v879_v60 = vshll.u32 %v1630_v40, 16  ;;  %1745 = vmatpush3.bf16.msra.mxu0 %v2558_v44  ;;  %1748 = vmatprep.mubr.msk.bf16.mxu0 %vm703_vm12, %v1653_v46 }
 0x13d   : > { %v834_v61 = vor.u32 %v833_v38, %v830_v37  ;;  %v858_v62 = vrot.slane %v856_v56, 4  ;;  %v665_v1 = vsel %vm655_vm10, %v654_v52, %v598_v53  ;;  %1746 = vmatprep.subr.bf16.mxu0 %v1904_v48  ;;  %v848_v3 = vor.u32 %v847_v41, %v844_v9 }
 0x13e   : > { %v861_v0 = vrot.slane %v859_v57, 5  ;;  %v643_v43 = vpop.permute.xlu0 %642  ;;  %v876_v4 = vor.u32 %v875_v59, %v872_v58  ;;  %v865_v5 = vshll.u32 %v1628_v51, 16  ;;  %v881_v14 = vrot.slane %v879_v60, 5 }
 0x13f   : > { %v676_v44 = vsel %vm666_vm11, %v665_v1, %v643_v43  ;;  %v835_v6 = vrot.slane %v834_v61, 4  ;;  %v849_v12 = vrot.slane %v848_v3, 4 }
 0x140   : > { %v1654_v7 = vcombine.low %v2594_v33, %v676_v44  ;;  %v1667_v8 = vcombine.low %v676_v44, %v676_v44  ;;  %v1668_v11 = vcombine.high %v676_v44, %v676_v44  ;;  %v877_v13 = vrot.slane %v876_v4, 4  ;;  %1747 = vmatpush3.bf16.msra.mxu0 %v1904_v48 }
 0x141   : > { %v840_v16 = vsel %vm2614_vm15, %v835_v6, %v839_v55  ;;  %v862_v17 = vor.u32 %v861_v0, %v858_v62  ;;  %v854_v21 = vsel %vm2614_vm15, %v849_v12, %v853_v54  ;;  %v867_v22 = vrot.slane %v865_v5, 5 }
 0x142   : > { %v1147_v19 = vshrl.u32 %v1667_v8, 16  ;;  %v1150_v20 = vshll.u32 %v1667_v8, 16  ;;  %v882_v10 = vsel %vm2614_vm15, %v877_v13, %v881_v14  ;;  %v1635_v24 = vcombine.low %v840_v16, %v854_v21 }
 0x143   : > { %v863_v23 = vrot.slane %v862_v17, 4  ;;  %v1156_v26 = vshll.u32 %v1668_v11, 16  ;;  %1749 = vmatmul.mubr.msk.bf16.vlgmr.msra.gmra.mrb[4].mxu0 %vm703_vm12, %v1654_v7 }
 0x144   : > { %v1149_v18 = vrot.slane %v1147_v19, 4  ;;  %v1152_v25 = vrot.slane %v1150_v20, 5  ;;  %1740 = vmatprep.mubr.msk.bf16.mxu1 %vm703_vm12, %v1635_v24 }
 0x145   : > { %v868_v27 = vsel %vm2614_vm15, %v863_v23, %v867_v22  ;;  %v1158_v32 = vrot.slane %v1156_v26, 5 }
 0x146   : > { %v1153_v28 = vor.u32 %v1152_v25, %v1149_v18  ;;  %v1636_v29 = vcombine.low %v868_v27, %v882_v10  ;;  %v1673_v15 = vcombine.low %v854_v21, %v868_v27 }
 0x148   : > { %v1154_v31 = vrot.slane %v1153_v28, 4  ;;  %1741 = vmatmul.mubr.msk.bf16.vlgmr.msra.gmra.mrb[0].mxu1 %vm703_vm12, %v1636_v29 }
 0x149   : > { %1753 = vmatpush3.bf16.msra.mxu1 %v2574_v63  ;;  %1756 = vmatprep.mubr.msk.bf16.mxu1 %vm703_vm12, %v1673_v15 }
 0x14a   : > { %v1159_v33 = vsel %vm2614_vm15, %v1154_v31, %v1158_v32  ;;  %1754 = vmatprep.subr.bf16.mxu1 %v1907_v30 }
 0x14b   : > { %v1674_v34 = vcombine.low %v882_v10, %v1159_v33 }
 0x14d   : > { %1755 = vmatpush3.bf16.msra.mxu1 %v1907_v30 }
 0x150   : > { %1757 = vmatmul.mubr.msk.bf16.vlgmr.msra.gmra.mrb[4].mxu1 %vm703_vm12, %v1674_v34 }
 0x20e   : > { %v1734_v9 = vpop.f32.mrb[0].mxu0 }
 0x20f   : > { %v1698_v35 = vpack.c.bf16 %v1734_v9, %v1734_v9  ;;  %v744_v36 = vpop.f32.mrb[1].mxu0  ;;  %v775_v63 = vmul.f32 %v1734_v9, %v1734_v9  ;;  %v762_v49 = vsel %vm655_vm10, %v1734_v9, 0.0 }
 0x210   : > { %v773_v37 = vmul.f32 %v744_v36, %v744_v36  ;;  %v1696_v38 = vpack.c.bf16 %v744_v36, %v744_v36  ;;  %v1735_v39 = vpop.f32.mrb[2].mxu0  ;;  %v759_v42 = vsel %vm655_vm10, %v744_v36, 0.0 }
 0x211   : > { %810 = vst.msk [vmem:[%s2513_s18 + $0x8] sm:$0xf] %vm807_vm0, %v1698_v35  ;;  %v1699_v40 = vpack.c.bf16 %v1735_v39, %v1735_v39  ;;  %v747_v41 = vpop.f32.mrb[3].mxu0  ;;  %v776_v51 = vmul.f32 %v1735_v39, %v1735_v39  ;;  %v780_v55 = vsel %vm655_vm10, %v775_v63, 0.0  ;;  %v764_v56 = vsel %vm655_vm10, %v1735_v39, 0.0 }
 0x212   : > { %808 = vst.msk [vmem:[%s2513_s18] sm:$0xf] %vm807_vm0, %v1696_v38  ;;  %v760_v45 = vsel %vm655_vm10, %v747_v41, 0.0  ;;  %v774_v46 = vmul.f32 %v747_v41, %v747_v41  ;;  %v1697_v47 = vpack.c.bf16 %v747_v41, %v747_v41  ;;  %v777_v50 = vsel %vm655_vm10, %v773_v37, 0.0 }
 0x213   : > { %811 = vst.msk [vmem:[%s2513_s18 + $0xc] sm:$0xf] %vm807_vm0, %v1699_v40  ;;  %v761_v48 = vadd.f32 %v760_v45, %v759_v42  ;;  %v782_v61 = vsel %vm655_vm10, %v776_v51, 0.0 }
 0x214   : > { %v778_v52 = vsel %vm655_vm10, %v774_v46, 0.0  ;;  %809 = vst.msk [vmem:[%s2513_s18 + $0x4] sm:$0xf] %vm807_vm0, %v1697_v47 }
 0x215   : > { %v763_v53 = vadd.f32 %v762_v49, %v761_v48  ;;  %v779_v54 = vadd.f32 %v778_v52, %v777_v50 }
 0x216   : > { %v1750_v57 = vpop.f32.mrb[4].mxu0 }
 0x217   : > { %v765_v58 = vadd.f32 %v764_v56, %v763_v53  ;;  %v781_v59 = vadd.f32 %v780_v55, %v779_v54  ;;  %v1075_v60 = vpop.f32.mrb[5].mxu0  ;;  %v1706_v62 = vpack.c.bf16 %v1750_v57, %v1750_v57  ;;  %v1106_v13 = vmul.f32 %v1750_v57, %v1750_v57 }
 0x218   : > { %v1704_v0 = vpack.c.bf16 %v1075_v60, %v1075_v60  ;;  %v1751_v1 = vpop.f32.mrb[6].mxu0  ;;  %v1104_v4 = vmul.f32 %v1075_v60, %v1075_v60  ;;  %v1090_v11 = vsel %vm655_vm10, %v1075_v60, 0.0  ;;  %v1093_v20 = vsel %vm655_vm10, %v1750_v57, 0.0 }
 0x219   : > { %v766_v43 = vrot.slane %v765_v58, 4  ;;  %v783_v2 = vadd.f32 %v782_v61, %v781_v59  ;;  %v1078_v3 = vpop.f32.mrb[7].mxu0  ;;  %1665 = vst.msk [vmem:[%s2513_s18 + $0x28] sm:$0xf] %vm807_vm0, %v1706_v62  ;;  %v1707_v5 = vpack.c.bf16 %v1751_v1, %v1751_v1  ;;  %v1107_v21 = vmul.f32 %v1751_v1, %v1751_v1 }
 0x21a   : > { %1663 = vst.msk [vmem:[%s2513_s18 + $0x20] sm:$0xf] %vm807_vm0, %v1704_v0  ;;  %v1091_v6 = vsel %vm655_vm10, %v1078_v3, 0.0  ;;  %v1105_v17 = vmul.f32 %v1078_v3, %v1078_v3  ;;  %v1705_v22 = vpack.c.bf16 %v1078_v3, %v1078_v3  ;;  %v1108_v10 = vsel %vm655_vm10, %v1104_v4, 0.0 }
 0x21b   : > { %v1742_v44 = vpop.f32.mrb[0].mxu1  ;;  %v767_v7 = vadd.f32 %v766_v43, %v765_v58  ;;  %v784_v8 = vrot.slane %v783_v2, 4  ;;  %1666 = vst.msk [vmem:[%s2513_s18 + $0x2c] sm:$0xf] %vm807_vm0, %v1707_v5  ;;  %v1092_v16 = vadd.f32 %v1091_v6, %v1090_v11  ;;  %v1095_v24 = vsel %vm655_vm10, %v1751_v1, 0.0 }
 0x21c   : > { %v946_v12 = vpop.f32.mrb[1].mxu1  ;;  %v1702_v14 = vpack.c.bf16 %v1742_v44, %v1742_v44  ;;  %v1109_v25 = vsel %vm655_vm10, %v1105_v17, 0.0  ;;  %1664 = vst.msk [vmem:[%s2513_s18 + $0x24] sm:$0xf] %vm807_vm0, %v1705_v22  ;;  %v1111_v15 = vsel %vm655_vm10, %v1106_v13, 0.0  ;;  %v964_v30 = vsel %vm655_vm10, %v1742_v44, 0.0 }
 0x21d   : > { %v1743_v19 = vpop.f32.mrb[2].mxu1  ;;  %v1094_v18 = vadd.f32 %v1093_v20, %v1092_v16  ;;  %v768_v26 = vrot.slane %v767_v7, 2  ;;  %v785_v27 = vadd.f32 %v784_v8, %v783_v2  ;;  %v1110_v28 = vadd.f32 %v1109_v25, %v1108_v10 }
 0x21e   : > { %v949_v23 = vpop.f32.mrb[3].mxu1  ;;  %1647 = vst.msk [vmem:[%s2513_s18 + $0x18] sm:$0xf] %vm807_vm0, %v1702_v14  ;;  %v1700_v29 = vpack.c.bf16 %v946_v12, %v946_v12  ;;  %v975_v32 = vmul.f32 %v946_v12, %v946_v12  ;;  %v1113_v33 = vsel %vm655_vm10, %v1107_v21, 0.0  ;;  %v977_v34 = vmul.f32 %v1742_v44, %v1742_v44 }
 0x21f   : > { %v1096_v31 = vadd.f32 %v1095_v24, %v1094_v18  ;;  %v1112_v9 = vadd.f32 %v1111_v15, %v1110_v28  ;;  %v1703_v35 = vpack.c.bf16 %v1743_v19, %v1743_v19  ;;  %v961_v37 = vsel %vm655_vm10, %v946_v12, 0.0 }
 0x220   : > { %1645 = vst.msk [vmem:[%s2513_s18 + $0x10] sm:$0xf] %vm807_vm0, %v1700_v29  ;;  %v962_v38 = vsel %vm655_vm10, %v949_v23, 0.0  ;;  %v976_v39 = vmul.f32 %v949_v23, %v949_v23  ;;  %v2678_v40 = vadd.f32 %v768_v26, %v767_v7  ;;  %v786_v41 = vrot.slane %v785_v27, 2 }
 0x221   : > { %v1097_v36 = vrot.slane %v1096_v31, 4  ;;  %v1114_v42 = vadd.f32 %v1113_v33, %v1112_v9  ;;  %1648 = vst.msk [vmem:[%s2513_s18 + $0x1c] sm:$0xf] %vm807_vm0, %v1703_v35  ;;  %v963_v45 = vadd.f32 %v962_v38, %v961_v37  ;;  %v979_v47 = vsel %vm655_vm10, %v975_v32, 0.0 }
 0x222   : > { %v978_v48 = vmul.f32 %v1743_v19, %v1743_v19  ;;  %v980_v49 = vsel %vm655_vm10, %v976_v39, 0.0  ;;  %v1701_v50 = vpack.c.bf16 %v949_v23, %v949_v23  ;;  %v982_v57 = vsel %vm655_vm10, %v977_v34, 0.0 }
 0x223   : > { %v1758_v63 = vpop.f32.mrb[4].mxu1  ;;  %v1098_v52 = vadd.f32 %v1097_v36, %v1096_v31  ;;  %v1115_v53 = vrot.slane %v1114_v42, 4  ;;  %v965_v54 = vadd.f32 %v964_v30, %v963_v45  ;;  %v981_v55 = vadd.f32 %v980_v49, %v979_v47 }
 0x224   : > { %v1220_v46 = vpop.f32.mrb[5].mxu1  ;;  %v966_v58 = vsel %vm655_vm10, %v1743_v19, 0.0  ;;  %1646 = vst.msk [vmem:[%s2513_s18 + $0x14] sm:$0xf] %vm807_vm0, %v1701_v50  ;;  %v1710_v59 = vpack.c.bf16 %v1758_v63, %v1758_v63  ;;  %v770_v0 = vrot.slane %v2678_v40, 1  ;;  %v984_v1 = vsel %vm655_vm10, %v978_v48, 0.0 }
 0x225   : > { %v1759_v51 = vpop.f32.mrb[6].mxu1  ;;  %v1116_v60 = vadd.f32 %v1115_v53, %v1114_v42  ;;  %v967_v61 = vadd.f32 %v966_v58, %v965_v54  ;;  %v983_v62 = vadd.f32 %v982_v57, %v981_v55  ;;  %v1708_v43 = vpack.c.bf16 %v1220_v46, %v1220_v46 }
 0x226   : > { %v1223_v56 = vpop.f32.mrb[7].mxu1  ;;  %1685 = vst.msk [vmem:[%s2513_s18 + $0x38] sm:$0xf] %vm807_vm0, %v1710_v59  ;;  %v787_v2 = vadd.f32 %v786_v41, %v785_v27  ;;  %v1099_v3 = vrot.slane %v1098_v52, 2  ;;  %v1235_v44 = vsel %vm655_vm10, %v1220_v46, 0.0  ;;  %v1249_v6 = vmul.f32 %v1220_v46, %v1220_v46 }
 0x227   : > { %v968_v4 = vrot.slane %v967_v61, 4  ;;  %v985_v5 = vadd.f32 %v984_v1, %v983_v62  ;;  %1683 = vst.msk [vmem:[%s2513_s18 + $0x30] sm:$0xf] %vm807_vm0, %v1708_v43  ;;  %v1711_v7 = vpack.c.bf16 %v1759_v51, %v1759_v51  ;;  %v1236_v8 = vsel %vm655_vm10, %v1223_v56, 0.0 }
 0x228   : > { %v1117_v11 = vrot.slane %v1116_v60, 2  ;;  %v1237_v14 = vadd.f32 %v1236_v8, %v1235_v44  ;;  %v1238_v16 = vsel %vm655_vm10, %v1758_v63, 0.0  ;;  %v1251_v17 = vmul.f32 %v1758_v63, %v1758_v63  ;;  %v1340_v44 = vld [vmem:[%s2513_s18 + $0x20] sm:$0xff] (%p2871_p12)  }
 0x229   : > { %v969_v12 = vadd.f32 %v968_v4, %v967_v61  ;;  %v986_v13 = vrot.slane %v985_v5, 4  ;;  %1686 = vst.msk [vmem:[%s2513_s18 + $0x3c] sm:$0xf] %vm807_vm0, %v1711_v7  ;;  %v1250_v19 = vmul.f32 %v1223_v56, %v1223_v56  ;;  %v1709_v20 = vpack.c.bf16 %v1223_v56, %v1223_v56  ;;  %1341 = vst [vmem:[%s1308_s7 + $0x40] sm:$0xff] (%p2871_p12), %v1340_v44  }
 0x22a   : > { %v1100_v21 = vadd.f32 %v1099_v3, %v1098_v52  ;;  %v1239_v10 = vadd.f32 %v1238_v16, %v1237_v14  ;;  %v1253_v24 = vsel %vm655_vm10, %v1249_v6, 0.0  ;;  %v1240_v18 = vsel %vm655_vm10, %v1759_v51, 0.0  ;;  %v1328_v3 = vld [vmem:[%s2513_s18 + $0x8] sm:$0xff] (%p2871_p12)  }
 0x22b   : > { %v970_v22 = vrot.slane %v969_v12, 2  ;;  %v987_v23 = vadd.f32 %v986_v13, %v985_v5  ;;  %v1252_v25 = vmul.f32 %v1759_v51, %v1759_v51  ;;  %v1254_v26 = vsel %vm655_vm10, %v1250_v19, 0.0  ;;  %1684 = vst.msk [vmem:[%s2513_s18 + $0x34] sm:$0xf] %vm807_vm0, %v1709_v20  ;;  %v1332_v4 = vld [vmem:[%s2513_s18 + $0x10] sm:$0xff] (%p2871_p12)   ;;  %v1336_v5 = vld [vmem:[%s2513_s18 + $0x18] sm:$0xff] (%p2871_p12)  }
 0x22c   : > { %v1118_v27 = vadd.f32 %v1117_v11, %v1116_v60  ;;  %v1241_v15 = vadd.f32 %v1240_v18, %v1239_v10  ;;  %v788_v30 = vrot.slane %v787_v2, 1  ;;  %v1256_v31 = vsel %vm655_vm10, %v1251_v17, 0.0  ;;  %v1344_v6 = vld [vmem:[%s2513_s18 + $0x28] sm:$0xff] (%p2871_p12)   ;;  %1329 = vst [vmem:[%s1308_s7 + $0x8] sm:$0xff] (%p2871_p12), %v1328_v3   ;;  %1333 = vst [vmem:[%s1308_s7 + $0x20] sm:$0xff] (%p2871_p12), %v1332_v4  }
 0x22d   : > { %v971_v28 = vadd.f32 %v970_v22, %v969_v12  ;;  %v988_v29 = vrot.slane %v987_v23, 2  ;;  %v1255_v32 = vadd.f32 %v1254_v26, %v1253_v24  ;;  %v1101_v33 = vrot.slane %v1100_v21, 1  ;;  %1337 = vst [vmem:[%s1308_s7 + $0x28] sm:$0xff] (%p2871_p12), %v1336_v5   ;;  %1345 = vst [vmem:[%s1308_s7 + $0x48] sm:$0xff] (%p2871_p12), %v1344_v6  }
 0x22e   : > { %v1242_v35 = vrot.slane %v1241_v15, 4  ;;  %v771_v36 = vadd.f32 %v770_v0, %v2678_v40  ;;  %v1258_v37 = vsel %vm655_vm10, %v1252_v25, 0.0  ;;  %v1119_v39 = vrot.slane %v1118_v27, 1 }
 0x22f   : > { %v972_v34 = vrot.slane %v971_v28, 1  ;;  %v989_v9 = vadd.f32 %v988_v29, %v987_v23  ;;  %v1257_v38 = vadd.f32 %v1256_v31, %v1255_v32  ;;  %v789_v45 = vadd.f32 %v788_v30, %v787_v2  ;;  %v1324_v2 = vld [vmem:[%s2513_s18] sm:$0xff] (%p2871_p12)  }
 0x230   : > { %v1243_v42 = vadd.f32 %v1242_v35, %v1241_v15  ;;  %v1102_v47 = vadd.f32 %v1101_v33, %v1100_v21  ;;  %v1120_v52 = vadd.f32 %v1119_v39, %v1118_v27  ;;  %v1352_v8 = vld [vmem:[%s2513_s18 + $0x38] sm:$0xff] (%p2871_p12)   ;;  %1325 = vst [vmem:[%s1308_s7] sm:$0xff] (%p2871_p12), %v1324_v2  }
 0x231   : > { %v973_v63 = vadd.f32 %v972_v34, %v971_v28  ;;  %v990_v41 = vrot.slane %v989_v9, 1  ;;  %v1259_v46 = vadd.f32 %v1258_v37, %v1257_v38  ;;  %1353 = vst [vmem:[%s1308_s7 + $0x68] sm:$0xff] (%p2871_p12), %v1352_v8  }
 0x232   : > { %v1244_v50 = vrot.slane %v1243_v42, 2  ;;  %v1348_v7 = vld [vmem:[%s2513_s18 + $0x30] sm:$0xff] (%p2871_p12)  }
 0x233   : > { %v974_v48 = vadd.f32 %v973_v63, %v771_v36  ;;  %v991_v49 = vadd.f32 %v990_v41, %v989_v9  ;;  %v1260_v51 = vrot.slane %v1259_v46, 4  ;;  %1349 = vst [vmem:[%s1308_s7 + $0x60] sm:$0xff] (%p2871_p12), %v1348_v7  }
 0x234   : > { %v1245_v40 = vadd.f32 %v1244_v50, %v1243_v42 }
 0x235   : > { %v992_v53 = vadd.f32 %v991_v49, %v789_v45  ;;  %v1103_v54 = vadd.f32 %v1102_v47, %v974_v48  ;;  %v1261_v55 = vadd.f32 %v1260_v51, %v1259_v46 }
 0x236   : > { %v1246_v57 = vrot.slane %v1245_v40, 1 }
 0x237   : > { %v1121_v56 = vadd.f32 %v1120_v52, %v992_v53  ;;  %v1262_v58 = vrot.slane %v1261_v55, 2 }
 0x238   : > { %v1247_v59 = vadd.f32 %v1246_v57, %v1245_v40 }
 0x239   : > { %v1263_v60 = vadd.f32 %v1262_v58, %v1261_v55 }
 0x23a   : > { %v1248_v61 = vadd.f32 %v1247_v59, %v1103_v54 }
 0x23b   : > { %v1264_v62 = vrot.slane %v1263_v60, 1 }
 0x23c   : > { %1303 = sbr.rel (!%p2871_p12) target bundleno = 579 (0x243), region = 56 }
 0x23d   : > { %v1265_v0 = vadd.f32 %v1264_v62, %v1263_v60 }
 0x23f   : > { %v1266_v1 = vadd.f32 %v1265_v0, %v1121_v56 }
 0x241   : > { %v1289_v43 = vsel %vm1288_vm1, %v1248_v61, %v1266_v1 }
 0x242   : > { %1291 = vst.msk [vmem:[%s2517_s21] sm:$0x3] %vm1290_vm2, %v1289_v43 }
 0x243 PF: > { %s2873_s9 = sld [smem:[#allocation21_spill]]  ;;  %s1692_s20 = sshll.u32 %s2106_s28, 1 }
 0x244   : > { %s1419_s29 = sshll.u32 %s2517_s21, 4  ;;  %s1415_s18 = sadd.s32 %s2102_s27, %s1692_s20  ;;  %s2727_s29 = int_to_ptr.vmem [resolvable:$true] %s1419_s29 }
 0x245   : > { %s1693_s16 = sshll.u32 %s1415_s18, 5  ;;  %s2874_s5 = sld [smem:[#allocation26_spill]] }
 0x246   : > { %s1968_s12 = scalar_lea.vmem %s2727_s29, 32  ;;  %s2125_s8 = smov [#allocation9]  }
 0x247   : > { %p1969_p3 = scmp.ne.s32.totalorder %s2727_s29, %s1968_s12  ;;  %s1972_s13 = sshll.u32 %s2125_s8, 4  ;;  %s1973_s13 = int_to_ptr.vmem [resolvable:$false] %s1972_s13 }
 0x248   : > { %s1974_s28 = scalar_lea.vmem %s1973_s13, 64  ;;  %p1975_p11 = scmp.lt.s32.totalorder %s2727_s29, %s1973_s13 }
 0x249   : > { %p2875_p8 = scmp.ne.s32.totalorder %s2873_s9, 0  ;;  %p1976_p13 = scmp.lt.s32.totalorder %s1974_s28, %s1968_s12 }
 0x24b   : > { %s1417_s0 = scalar_lea.hbm %s2874_s5, %s1693_s16  ;;  %p1970_p5 = pnand %p1969_p3, %p2875_p8 }
 0x24c   : > { %p1977_p2 = por %p1976_p13, %p1975_p11 }
 0x24d   : > { %p1971_p1 = pneg %p1970_p5 }
 0x24f   : > { %p1978_p10 = pnand %p1977_p2, %p1971_p1 }
 0x251   : > { %1981 = shalt.err (!%p1978_p10)
}
 0x252   : > { %s1982_s27 = scalar_lea.hbm %s1417_s0, 32  ;;  %s1986_s15 = scalar_lea.hbm %s2874_s5, 128 }
 0x253   : > { %p1983_p4 = scmp.ne.s32.totalorder %s1417_s0, %s1982_s27  ;;  %p1987_p9 = scmp.lt.u32.totalorder %s1417_s0, %s2874_s5 }
 0x254   : > { %p1988_p7 = scmp.lt.u32.totalorder %s1986_s15, %s1982_s27  ;;  %p1990_p3 = scmp.lt.u32.totalorder %s1982_s27, %s1417_s0 }
 0x255   : > { %p1984_p0 = pnand %p1983_p4, %p2875_p8 }
 0x256   : > { %p1989_p12 = por %p1988_p7, %p1987_p9 }
 0x257   : > { %p1985_p6 = pneg %p1984_p0 }
 0x258   : > { %p1991_p5 = por %p1990_p3, %p1989_p12 }
 0x25a   : > { %p1992_p1 = pnand %p1991_p5, %p1985_p6 }
 0x25c   : > { %1995 = shalt.err (!%p1992_p1)
}
 0x25d   : > { %1764 = dma.vmem_to_hbm [thread:$0]  (%p2875_p8), %s2727_s29, 32, %s1417_s0, %s1297_s1  }
 0x25e PF: > { %s2876_s20 = sld [smem:[#allocation13_spill]]  ;;  %p1778_p11 = scmp.ge.s32.totalorder %s2118_s6, 2 }
 0x25f   : > { %p2877_p13 = scmp.ne.s32.totalorder %s2844_s10, 0 }
 0x261   : > { %p1774_p2 = pnand %p1778_p11, %p2877_p13 }
 0x264   : > { %s1438_s18 = sand.u32 1, %s2876_s20  }
 0x265   : > { %s1439_s16 = scalar_lea.sflag [#allocation5], %s1438_s18 }
 0x266   : > { %2061 = dma.done.wait (!%p1774_p2), %s1439_s16, 32  }
 0x267   : > { %2063 = vsyncadd (!%p1774_p2), %s1439_s16, 4294967264  ;;  %s25_s6 = sadd.s32 1, %s2118_s6   ;;  %s2879_s24 = sld [smem:[#allocation14_spill]] }
 0x268   : > { %p2755_p10 = scmp.ge.s32.totalorder %s25_s6, 6   ;;  %s2880_s20 = sld [smem:[#allocation20_spill]] }
 0x269   : > { %s2881_s1 = sld [smem:[#allocation15_spill]]  ;;  %s2882_s9 = sld [smem:[#allocation19_spill]] }
 0x26a   : > { %s2883_s27 = sld [smem:[#allocation16_spill]]  ;;  %s2884_s29 = sld [smem:[#allocation17_spill]] }
 0x26b   : > { %s2885_s10 = sld [smem:[#allocation18_spill]]  ;;  %s2887_s18 = smov %s2070_s19 }
 0x26c   : > { %s2889_s21 = smov %s2082_s22  ;;  %s2890_s22 = smov %s2086_s23 }
 0x26d   : > { %s2888_s19 = smov %s2879_s24  ;;  %s2891_s23 = smov %s2381_s17 }
 0x26e   : > { %s2892_s24 = smov %s2094_s25  ;;  %s2895_s28 = smov %s2114_s30 }
 0x26f   : > { %s2893_s25 = smov %s2881_s1  ;;  %s2894_s26 = smov %s2882_s9 }
 0x270   :  { %24 = sbr.rel (!%p2755_p10) target bundleno = 18 (0x12), region = 166 }
 0x271   : > { %s2896_s30 = smov %s2885_s10 }
 0x277   :  { %1444 = vsyncpa [#allocation4], 1 }
 0x278   :  { %1446 = vsyncpa [#allocation4 + $0x1], 1 }
 0x279   :  { %1447 = vsyncpa [#allocation7], 1 }
 0x27a   :  { %1449 = vsyncpa [#allocation7 + $0x1], 1 }
 0x27b   :  { %1450 = vsyncpa [#allocation5], 1 }
 0x27c   :  { %1452 = vsyncpa [#allocation5 + $0x1], 1 }

</bundles_post_ra>
